<compile_context>
chip_gen: v5e
topology: v5e:2x2
jax: 0.10.0
libtpu: 0.0.40
codegen_flags: <defaults>
</compile_context>

<pallas_src>
import jax
import jax.numpy as jnp
from jax.experimental import pallas as pl
from jax.experimental.pallas import tpu as pltpu

BP = 8  # f32 sublane multiple the batch is padded to


def icalstm_kernel(x_ref, h0_ref, c0_ref,
                   wcomb_ref, bcomb_ref, whh_ref,
                   fcw_ref, fcb_ref,
                   out_ref, gx_ref):
    # x_ref: (T*Bp, C)  time-major slab (batch zero-padded to Bp sublanes)
    # h0/c0: (Bp, H); wcomb: (C, 4H); bcomb: (1, 4H); whh: (H, 4H)
    # fcw: (H, Op); fcb: (1, Op); out: (Bp, Op); gx_ref: (T*Bp, 4H) VMEM scratch
    TB, _C = x_ref.shape
    Bp, H = h0_ref.shape
    T = TB // Bp

    # Hoisted input-side gate projection over the whole (T*Bp, C) slab:
    # one big MXU matmul + bias, staged to VMEM scratch.
    gx_ref[...] = (jnp.dot(x_ref[...], wcomb_ref[...],
                           preferred_element_type=jnp.float32)
                   + bcomb_ref[...])                           # (T*Bp, 4H)

    whh_t = whh_ref[...]                                       # (H, 4H)
    h = h0_ref[...]                                            # (Bp, H) f32
    c = c0_ref[...]                                            # (Bp, H) f32

    # LSTM recurrence (unrolled; T is a small static trip count).
    # Per step: 1 aligned vld of the precomputed gates tile, 1 MXU push,
    # 1 full-width sigmoid + 1 narrow tanh on the EUP, VPU gating.
    for t in range(T):
        gates = gx_ref[t * Bp:(t + 1) * Bp, :] + jnp.dot(
            h, whh_t, preferred_element_type=jnp.float32)      # (Bp, 4H)
        sig = jax.nn.sigmoid(gates)                            # full-lane EUP
        i_g = sig[:, 0 * H:1 * H]
        f_g = sig[:, 1 * H:2 * H]
        o_g = sig[:, 3 * H:4 * H]
        g_g = jnp.tanh(gates[:, 2 * H:3 * H])                  # g-gate only
        c = f_g * c + i_g * g_g
        h = o_g * jnp.tanh(c)

    # Final fc on the last time-step hidden state (lane-padded output).
    out = (jnp.dot(h, fcw_ref[...], preferred_element_type=jnp.float32)
           + fcb_ref[...])
    out_ref[...] = out.astype(out_ref.dtype)


def icalstm_forward(x, h0, c0, params):
    """x: (B, C, T); h0, c0: (1, B, H) (num_layers*num_directions = 1)."""
    B, C, T = x.shape
    H = h0.shape[-1]
    O = params["fc_w"].shape[0]
    Bp = max(BP, B)
    Op = max(128, ((O + 127) // 128) * 128)   # lane-dense output width

    # Glue (wrapper-side, constant-foldable by XLA): permute + batch pad + flatten.
    xt = jnp.transpose(x, (2, 0, 1))                            # (T, B, C)
    xt = jnp.pad(xt, ((0, 0), (0, Bp - B), (0, 0)))             # (T, Bp, C)
    x_2d = xt.reshape(T * Bp, C)                                # (T*Bp, C)
    h0_ = jnp.pad(h0[0], ((0, Bp - B), (0, 0)))                 # (Bp, H)
    c0_ = jnp.pad(c0[0], ((0, Bp - B), (0, 0)))                 # (Bp, H)

    # Fold V, W, W_ih and both LSTM biases into one combined, pre-transposed
    # input projection:
    #   gates_x = ((x @ V_w.T + V_b) @ W_w.T) @ W_ih.T + b_ih + b_hh
    w_chain = params["W_w"].T @ params["W_ih"].T                # (C, 4H)
    w_comb_t = params["V_w"].T @ w_chain                        # (C, 4H)
    b_comb = (params["V_b"] @ w_chain
              + params["b_ih"] + params["b_hh"]).reshape(1, -1)  # (1, 4H)
    whh_t = params["W_hh"].T                                    # (H, 4H)

    # Pre-transposed, lane-padded fc (zero columns -> sliced off below).
    fcw_t = jnp.pad(params["fc_w"].T, ((0, 0), (0, Op - O)))    # (H, Op)
    fcb = jnp.pad(params["fc_b"], ((0, Op - O),)).reshape(1, -1)  # (1, Op)

    vmem = pl.BlockSpec(memory_space=pltpu.MemorySpace.VMEM)
    out_p = pl.pallas_call(
        icalstm_kernel,
        out_shape=jax.ShapeDtypeStruct((Bp, Op), jnp.float32),
        in_specs=[vmem] * 8,
        out_specs=vmem,
        scratch_shapes=[pltpu.VMEM((T * Bp, 4 * H), jnp.float32)],
    )(x_2d, h0_, c0_, w_comb_t, b_comb, whh_t, fcw_t, fcb)
    return out_p[:B, :O]


def icalstm_reference(x, h0, c0, p):
    """Pure-JAX reference mirroring the PyTorch forward exactly (unfolded)."""
    xt = jnp.transpose(x, (2, 0, 1))                            # (T, B, C)
    xt = xt @ p["V_w"].T + p["V_b"]
    xt = xt @ p["W_w"].T
    H = h0.shape[-1]
    h, c = h0[0], c0[0]
    for t in range(xt.shape[0]):
        g = xt[t] @ p["W_ih"].T + p["b_ih"] + h @ p["W_hh"].T + p["b_hh"]
        i = jax.nn.sigmoid(g[:, 0 * H:1 * H])
        f = jax.nn.sigmoid(g[:, 1 * H:2 * H])
        gg = jnp.tanh(g[:, 2 * H:3 * H])
        o = jax.nn.sigmoid(g[:, 3 * H:4 * H])
        c = f * c + i * gg
        h = o * jnp.tanh(c)
    return h @ p["fc_w"].T + p["fc_b"]


if __name__ == "__main__":
    B, C, T, H, O = 2, 4, 16, 32, 4

    key = jax.random.PRNGKey(0)
    keys = jax.random.split(key, 12)

    def init(k, shape, scale=0.1):
        return (scale * jax.random.normal(k, shape)).astype(jnp.float32)

    params = {
        "V_w":  init(keys[0], (C, C)),         # frozen V_weight
        "V_b":  init(keys[1], (C,)),           # frozen V_bias
        "W_w":  init(keys[2], (C, C)),         # frozen W_weight
        "W_ih": init(keys[3], (4 * H, C)),     # lstm weight_ih_l0
        "W_hh": init(keys[4], (4 * H, H)),     # lstm weight_hh_l0
        "b_ih": init(keys[5], (4 * H,)),       # lstm bias_ih_l0
        "b_hh": init(keys[6], (4 * H,)),       # lstm bias_hh_l0
        "fc_w": init(keys[7], (O, H)),         # fc weight
        "fc_b": init(keys[8], (O,)),           # fc bias
    }

    x = init(keys[9], (B, C, T), scale=1.0)
    h0 = jnp.zeros((1, B, H), jnp.float32)     # initHidden
    c0 = jnp.zeros((1, B, H), jnp.float32)

    out = jax.block_until_ready(icalstm_forward(x, h0, c0, params))
    ref = jax.block_until_ready(icalstm_reference(x, h0, c0, params))

    assert out.shape == (B, O)
    assert jnp.allclose(out, ref, rtol=1e-4, atol=1e-5), (out, ref)
    print("KERNEL_OK")
</pallas_src>

<mosaic_0001>
module attributes {stable_mosaic.version = 11 : i64} {
  func.func @icalstm_kernel(%arg0: memref<128x4xf32, #tpu.memory_space<vmem>>, %arg1: memref<8x32xf32, #tpu.memory_space<vmem>>, %arg2: memref<8x32xf32, #tpu.memory_space<vmem>>, %arg3: memref<4x128xf32, #tpu.memory_space<vmem>>, %arg4: memref<1x128xf32, #tpu.memory_space<vmem>>, %arg5: memref<32x128xf32, #tpu.memory_space<vmem>>, %arg6: memref<32x128xf32, #tpu.memory_space<vmem>>, %arg7: memref<1x128xf32, #tpu.memory_space<vmem>>, %arg8: memref<8x128xf32, #tpu.memory_space<vmem>>, %arg9: memref<128x128xf32, #tpu.memory_space<vmem>>) attributes {dimension_semantics = [], scalar_prefetch = 0 : i64, scratch_operands = 1 : i64, tpu.core_type = #tpu.core_type<tc>} {
    %c0 = arith.constant 0 : index
    %c0_0 = arith.constant 0 : index
    %0 = vector.load %arg0[%c0, %c0_0] : memref<128x4xf32, #tpu.memory_space<vmem>>, vector<128x4xf32>
    %c0_1 = arith.constant 0 : index
    %c0_2 = arith.constant 0 : index
    %1 = vector.load %arg3[%c0_1, %c0_2] : memref<4x128xf32, #tpu.memory_space<vmem>>, vector<4x128xf32>
    %cst = arith.constant dense<0.000000e+00> : vector<128x128xf32>
    %2 = tpu.matmul %0, %1, %cst {dimension_numbers = #tpu.dot_dimension_numbers<[1], [0], [0], [1], [0, 0, 1, 1], [], []>} : vector<128x4xf32>, vector<4x128xf32>, vector<128x128xf32> -> vector<128x128xf32>
    %c0_3 = arith.constant 0 : index
    %c0_4 = arith.constant 0 : index
    %3 = vector.load %arg4[%c0_3, %c0_4] : memref<1x128xf32, #tpu.memory_space<vmem>>, vector<1x128xf32>
    %4 = vector.broadcast %3 : vector<1x128xf32> to vector<128x128xf32>
    %5 = arith.addf %2, %4 : vector<128x128xf32>
    %c0_5 = arith.constant 0 : index
    %c0_6 = arith.constant 0 : index
    %6 = vector.load %arg9[%c0_5, %c0_6] : memref<128x128xf32, #tpu.memory_space<vmem>>, vector<128x128xf32>
    tpu.vector_store %arg9[%c0_5, %c0_6], %5 {strides = array<i32>} : memref<128x128xf32, #tpu.memory_space<vmem>>, vector<128x128xf32>,
    %c0_7 = arith.constant 0 : index
    %c0_8 = arith.constant 0 : index
    %7 = vector.load %arg5[%c0_7, %c0_8] : memref<32x128xf32, #tpu.memory_space<vmem>>, vector<32x128xf32>
    %c0_9 = arith.constant 0 : index
    %c0_10 = arith.constant 0 : index
    %8 = vector.load %arg1[%c0_9, %c0_10] : memref<8x32xf32, #tpu.memory_space<vmem>>, vector<8x32xf32>
    %c0_11 = arith.constant 0 : index
    %c0_12 = arith.constant 0 : index
    %9 = vector.load %arg2[%c0_11, %c0_12] : memref<8x32xf32, #tpu.memory_space<vmem>>, vector<8x32xf32>
    %c0_13 = arith.constant 0 : index
    %c0_14 = arith.constant 0 : index
    %10 = vector.load %arg9[%c0_13, %c0_14] : memref<128x128xf32, #tpu.memory_space<vmem>>, vector<8x128xf32>
    %cst_15 = arith.constant dense<0.000000e+00> : vector<8x128xf32>
    %11 = tpu.matmul %8, %7, %cst_15 {dimension_numbers = #tpu.dot_dimension_numbers<[1], [0], [0], [1], [0, 0, 1, 1], [], []>} : vector<8x32xf32>, vector<32x128xf32>, vector<8x128xf32> -> vector<8x128xf32>
    %12 = arith.addf %10, %11 : vector<8x128xf32>
    %13 = arith.negf %12 : vector<8x128xf32>
    %14 = math.exp %13 : vector<8x128xf32>
    %cst_16 = arith.constant 1.000000e+00 : f32
    %15 = vector.broadcast %cst_16 : f32 to vector<8x128xf32>
    %16 = arith.addf %15, %14 : vector<8x128xf32>
    %17 = arith.divf %15, %16 : vector<8x128xf32>
    %18 = vector.extract_strided_slice %17 {offsets = [0, 0], sizes = [8, 32], strides = [1, 1]} : vector<8x128xf32> to vector<8x32xf32>
    %19 = vector.extract_strided_slice %17 {offsets = [0, 32], sizes = [8, 32], strides = [1, 1]} : vector<8x128xf32> to vector<8x32xf32>
    %20 = vector.extract_strided_slice %17 {offsets = [0, 96], sizes = [8, 32], strides = [1, 1]} : vector<8x128xf32> to vector<8x32xf32>
    %21 = vector.extract_strided_slice %12 {offsets = [0, 64], sizes = [8, 32], strides = [1, 1]} : vector<8x128xf32> to vector<8x32xf32>
    %22 = math.tanh %21 : vector<8x32xf32>
    %23 = arith.mulf %19, %9 : vector<8x32xf32>
    %24 = arith.mulf %18, %22 : vector<8x32xf32>
    %25 = arith.addf %23, %24 : vector<8x32xf32>
    %26 = math.tanh %25 : vector<8x32xf32>
    %27 = arith.mulf %20, %26 : vector<8x32xf32>
    %c8 = arith.constant 8 : index
    %c0_17 = arith.constant 0 : index
    %28 = vector.load %arg9[%c8, %c0_17] : memref<128x128xf32, #tpu.memory_space<vmem>>, vector<8x128xf32>
    %cst_18 = arith.constant dense<0.000000e+00> : vector<8x128xf32>
    %29 = tpu.matmul %27, %7, %cst_18 {dimension_numbers = #tpu.dot_dimension_numbers<[1], [0], [0], [1], [0, 0, 1, 1], [], []>} : vector<8x32xf32>, vector<32x128xf32>, vector<8x128xf32> -> vector<8x128xf32>
    %30 = arith.addf %28, %29 : vector<8x128xf32>
    %31 = arith.negf %30 : vector<8x128xf32>
    %32 = math.exp %31 : vector<8x128xf32>
    %cst_19 = arith.constant 1.000000e+00 : f32
    %33 = vector.broadcast %cst_19 : f32 to vector<8x128xf32>
    %34 = arith.addf %33, %32 : vector<8x128xf32>
    %35 = arith.divf %33, %34 : vector<8x128xf32>
    %36 = vector.extract_strided_slice %35 {offsets = [0, 0], sizes = [8, 32], strides = [1, 1]} : vector<8x128xf32> to vector<8x32xf32>
    %37 = vector.extract_strided_slice %35 {offsets = [0, 32], sizes = [8, 32], strides = [1, 1]} : vector<8x128xf32> to vector<8x32xf32>
    %38 = vector.extract_strided_slice %35 {offsets = [0, 96], sizes = [8, 32], strides = [1, 1]} : vector<8x128xf32> to vector<8x32xf32>
    %39 = vector.extract_strided_slice %30 {offsets = [0, 64], sizes = [8, 32], strides = [1, 1]} : vector<8x128xf32> to vector<8x32xf32>
    %40 = math.tanh %39 : vector<8x32xf32>
    %41 = arith.mulf %37, %25 : vector<8x32xf32>
    %42 = arith.mulf %36, %40 : vector<8x32xf32>
    %43 = arith.addf %41, %42 : vector<8x32xf32>
    %44 = math.tanh %43 : vector<8x32xf32>
    %45 = arith.mulf %38, %44 : vector<8x32xf32>
    %c16 = arith.constant 16 : index
    %c0_20 = arith.constant 0 : index
    %46 = vector.load %arg9[%c16, %c0_20] : memref<128x128xf32, #tpu.memory_space<vmem>>, vector<8x128xf32>
    %cst_21 = arith.constant dense<0.000000e+00> : vector<8x128xf32>
    %47 = tpu.matmul %45, %7, %cst_21 {dimension_numbers = #tpu.dot_dimension_numbers<[1], [0], [0], [1], [0, 0, 1, 1], [], []>} : vector<8x32xf32>, vector<32x128xf32>, vector<8x128xf32> -> vector<8x128xf32>
    %48 = arith.addf %46, %47 : vector<8x128xf32>
    %49 = arith.negf %48 : vector<8x128xf32>
    %50 = math.exp %49 : vector<8x128xf32>
    %cst_22 = arith.constant 1.000000e+00 : f32
    %51 = vector.broadcast %cst_22 : f32 to vector<8x128xf32>
    %52 = arith.addf %51, %50 : vector<8x128xf32>
    %53 = arith.divf %51, %52 : vector<8x128xf32>
    %54 = vector.extract_strided_slice %53 {offsets = [0, 0], sizes = [8, 32], strides = [1, 1]} : vector<8x128xf32> to vector<8x32xf32>
    %55 = vector.extract_strided_slice %53 {offsets = [0, 32], sizes = [8, 32], strides = [1, 1]} : vector<8x128xf32> to vector<8x32xf32>
    %56 = vector.extract_strided_slice %53 {offsets = [0, 96], sizes = [8, 32], strides = [1, 1]} : vector<8x128xf32> to vector<8x32xf32>
    %57 = vector.extract_strided_slice %48 {offsets = [0, 64], sizes = [8, 32], strides = [1, 1]} : vector<8x128xf32> to vector<8x32xf32>
    %58 = math.tanh %57 : vector<8x32xf32>
    %59 = arith.mulf %55, %43 : vector<8x32xf32>
    %60 = arith.mulf %54, %58 : vector<8x32xf32>
    %61 = arith.addf %59, %60 : vector<8x32xf32>
    %62 = math.tanh %61 : vector<8x32xf32>
    %63 = arith.mulf %56, %62 : vector<8x32xf32>
    %c24 = arith.constant 24 : index
    %c0_23 = arith.constant 0 : index
    %64 = vector.load %arg9[%c24, %c0_23] : memref<128x128xf32, #tpu.memory_space<vmem>>, vector<8x128xf32>
    %cst_24 = arith.constant dense<0.000000e+00> : vector<8x128xf32>
    %65 = tpu.matmul %63, %7, %cst_24 {dimension_numbers = #tpu.dot_dimension_numbers<[1], [0], [0], [1], [0, 0, 1, 1], [], []>} : vector<8x32xf32>, vector<32x128xf32>, vector<8x128xf32> -> vector<8x128xf32>
    %66 = arith.addf %64, %65 : vector<8x128xf32>
    %67 = arith.negf %66 : vector<8x128xf32>
    %68 = math.exp %67 : vector<8x128xf32>
    %cst_25 = arith.constant 1.000000e+00 : f32
    %69 = vector.broadcast %cst_25 : f32 to vector<8x128xf32>
    %70 = arith.addf %69, %68 : vector<8x128xf32>
    %71 = arith.divf %69, %70 : vector<8x128xf32>
    %72 = vector.extract_strided_slice %71 {offsets = [0, 0], sizes = [8, 32], strides = [1, 1]} : vector<8x128xf32> to vector<8x32xf32>
    %73 = vector.extract_strided_slice %71 {offsets = [0, 32], sizes = [8, 32], strides = [1, 1]} : vector<8x128xf32> to vector<8x32xf32>
    %74 = vector.extract_strided_slice %71 {offsets = [0, 96], sizes = [8, 32], strides = [1, 1]} : vector<8x128xf32> to vector<8x32xf32>
    %75 = vector.extract_strided_slice %66 {offsets = [0, 64], sizes = [8, 32], strides = [1, 1]} : vector<8x128xf32> to vector<8x32xf32>
    %76 = math.tanh %75 : vector<8x32xf32>
    %77 = arith.mulf %73, %61 : vector<8x32xf32>
    %78 = arith.mulf %72, %76 : vector<8x32xf32>
    %79 = arith.addf %77, %78 : vector<8x32xf32>
    %80 = math.tanh %79 : vector<8x32xf32>
    %81 = arith.mulf %74, %80 : vector<8x32xf32>
    %c32 = arith.constant 32 : index
    %c0_26 = arith.constant 0 : index
    %82 = vector.load %arg9[%c32, %c0_26] : memref<128x128xf32, #tpu.memory_space<vmem>>, vector<8x128xf32>
    %cst_27 = arith.constant dense<0.000000e+00> : vector<8x128xf32>
    %83 = tpu.matmul %81, %7, %cst_27 {dimension_numbers = #tpu.dot_dimension_numbers<[1], [0], [0], [1], [0, 0, 1, 1], [], []>} : vector<8x32xf32>, vector<32x128xf32>, vector<8x128xf32> -> vector<8x128xf32>
    %84 = arith.addf %82, %83 : vector<8x128xf32>
    %85 = arith.negf %84 : vector<8x128xf32>
    %86 = math.exp %85 : vector<8x128xf32>
    %cst_28 = arith.constant 1.000000e+00 : f32
    %87 = vector.broadcast %cst_28 : f32 to vector<8x128xf32>
    %88 = arith.addf %87, %86 : vector<8x128xf32>
    %89 = arith.divf %87, %88 : vector<8x128xf32>
    %90 = vector.extract_strided_slice %89 {offsets = [0, 0], sizes = [8, 32], strides = [1, 1]} : vector<8x128xf32> to vector<8x32xf32>
    %91 = vector.extract_strided_slice %89 {offsets = [0, 32], sizes = [8, 32], strides = [1, 1]} : vector<8x128xf32> to vector<8x32xf32>
    %92 = vector.extract_strided_slice %89 {offsets = [0, 96], sizes = [8, 32], strides = [1, 1]} : vector<8x128xf32> to vector<8x32xf32>
    %93 = vector.extract_strided_slice %84 {offsets = [0, 64], sizes = [8, 32], strides = [1, 1]} : vector<8x128xf32> to vector<8x32xf32>
    %94 = math.tanh %93 : vector<8x32xf32>
    %95 = arith.mulf %91, %79 : vector<8x32xf32>
    %96 = arith.mulf %90, %94 : vector<8x32xf32>
    %97 = arith.addf %95, %96 : vector<8x32xf32>
    %98 = math.tanh %97 : vector<8x32xf32>
    %99 = arith.mulf %92, %98 : vector<8x32xf32>
    %c40 = arith.constant 40 : index
    %c0_29 = arith.constant 0 : index
    %100 = vector.load %arg9[%c40, %c0_29] : memref<128x128xf32, #tpu.memory_space<vmem>>, vector<8x128xf32>
    %cst_30 = arith.constant dense<0.000000e+00> : vector<8x128xf32>
    %101 = tpu.matmul %99, %7, %cst_30 {dimension_numbers = #tpu.dot_dimension_numbers<[1], [0], [0], [1], [0, 0, 1, 1], [], []>} : vector<8x32xf32>, vector<32x128xf32>, vector<8x128xf32> -> vector<8x128xf32>
    %102 = arith.addf %100, %101 : vector<8x128xf32>
    %103 = arith.negf %102 : vector<8x128xf32>
    %104 = math.exp %103 : vector<8x128xf32>
    %cst_31 = arith.constant 1.000000e+00 : f32
    %105 = vector.broadcast %cst_31 : f32 to vector<8x128xf32>
    %106 = arith.addf %105, %104 : vector<8x128xf32>
    %107 = arith.divf %105, %106 : vector<8x128xf32>
    %108 = vector.extract_strided_slice %107 {offsets = [0, 0], sizes = [8, 32], strides = [1, 1]} : vector<8x128xf32> to vector<8x32xf32>
    %109 = vector.extract_strided_slice %107 {offsets = [0, 32], sizes = [8, 32], strides = [1, 1]} : vector<8x128xf32> to vector<8x32xf32>
    %110 = vector.extract_strided_slice %107 {offsets = [0, 96], sizes = [8, 32], strides = [1, 1]} : vector<8x128xf32> to vector<8x32xf32>
    %111 = vector.extract_strided_slice %102 {offsets = [0, 64], sizes = [8, 32], strides = [1, 1]} : vector<8x128xf32> to vector<8x32xf32>
    %112 = math.tanh %111 : vector<8x32xf32>
    %113 = arith.mulf %109, %97 : vector<8x32xf32>
    %114 = arith.mulf %108, %112 : vector<8x32xf32>
    %115 = arith.addf %113, %114 : vector<8x32xf32>
    %116 = math.tanh %115 : vector<8x32xf32>
    %117 = arith.mulf %110, %116 : vector<8x32xf32>
    %c48 = arith.constant 48 : index
    %c0_32 = arith.constant 0 : index
    %118 = vector.load %arg9[%c48, %c0_32] : memref<128x128xf32, #tpu.memory_space<vmem>>, vector<8x128xf32>
    %cst_33 = arith.constant dense<0.000000e+00> : vector<8x128xf32>
    %119 = tpu.matmul %117, %7, %cst_33 {dimension_numbers = #tpu.dot_dimension_numbers<[1], [0], [0], [1], [0, 0, 1, 1], [], []>} : vector<8x32xf32>, vector<32x128xf32>, vector<8x128xf32> -> vector<8x128xf32>
    %120 = arith.addf %118, %119 : vector<8x128xf32>
    %121 = arith.negf %120 : vector<8x128xf32>
    %122 = math.exp %121 : vector<8x128xf32>
    %cst_34 = arith.constant 1.000000e+00 : f32
    %123 = vector.broadcast %cst_34 : f32 to vector<8x128xf32>
    %124 = arith.addf %123, %122 : vector<8x128xf32>
    %125 = arith.divf %123, %124 : vector<8x128xf32>
    %126 = vector.extract_strided_slice %125 {offsets = [0, 0], sizes = [8, 32], strides = [1, 1]} : vector<8x128xf32> to vector<8x32xf32>
    %127 = vector.extract_strided_slice %125 {offsets = [0, 32], sizes = [8, 32], strides = [1, 1]} : vector<8x128xf32> to vector<8x32xf32>
    %128 = vector.extract_strided_slice %125 {offsets = [0, 96], sizes = [8, 32], strides = [1, 1]} : vector<8x128xf32> to vector<8x32xf32>
    %129 = vector.extract_strided_slice %120 {offsets = [0, 64], sizes = [8, 32], strides = [1, 1]} : vector<8x128xf32> to vector<8x32xf32>
    %130 = math.tanh %129 : vector<8x32xf32>
    %131 = arith.mulf %127, %115 : vector<8x32xf32>
    %132 = arith.mulf %126, %130 : vector<8x32xf32>
    %133 = arith.addf %131, %132 : vector<8x32xf32>
    %134 = math.tanh %133 : vector<8x32xf32>
    %135 = arith.mulf %128, %134 : vector<8x32xf32>
    %c56 = arith.constant 56 : index
    %c0_35 = arith.constant 0 : index
    %136 = vector.load %arg9[%c56, %c0_35] : memref<128x128xf32, #tpu.memory_space<vmem>>, vector<8x128xf32>
    %cst_36 = arith.constant dense<0.000000e+00> : vector<8x128xf32>
    %137 = tpu.matmul %135, %7, %cst_36 {dimension_numbers = #tpu.dot_dimension_numbers<[1], [0], [0], [1], [0, 0, 1, 1], [], []>} : vector<8x32xf32>, vector<32x128xf32>, vector<8x128xf32> -> vector<8x128xf32>
    %138 = arith.addf %136, %137 : vector<8x128xf32>
    %139 = arith.negf %138 : vector<8x128xf32>
    %140 = math.exp %139 : vector<8x128xf32>
    %cst_37 = arith.constant 1.000000e+00 : f32
    %141 = vector.broadcast %cst_37 : f32 to vector<8x128xf32>
    %142 = arith.addf %141, %140 : vector<8x128xf32>
    %143 = arith.divf %141, %142 : vector<8x128xf32>
    %144 = vector.extract_strided_slice %143 {offsets = [0, 0], sizes = [8, 32], strides = [1, 1]} : vector<8x128xf32> to vector<8x32xf32>
    %145 = vector.extract_strided_slice %143 {offsets = [0, 32], sizes = [8, 32], strides = [1, 1]} : vector<8x128xf32> to vector<8x32xf32>
    %146 = vector.extract_strided_slice %143 {offsets = [0, 96], sizes = [8, 32], strides = [1, 1]} : vector<8x128xf32> to vector<8x32xf32>
    %147 = vector.extract_strided_slice %138 {offsets = [0, 64], sizes = [8, 32], strides = [1, 1]} : vector<8x128xf32> to vector<8x32xf32>
    %148 = math.tanh %147 : vector<8x32xf32>
    %149 = arith.mulf %145, %133 : vector<8x32xf32>
    %150 = arith.mulf %144, %148 : vector<8x32xf32>
    %151 = arith.addf %149, %150 : vector<8x32xf32>
    %152 = math.tanh %151 : vector<8x32xf32>
    %153 = arith.mulf %146, %152 : vector<8x32xf32>
    %c64 = arith.constant 64 : index
    %c0_38 = arith.constant 0 : index
    %154 = vector.load %arg9[%c64, %c0_38] : memref<128x128xf32, #tpu.memory_space<vmem>>, vector<8x128xf32>
    %cst_39 = arith.constant dense<0.000000e+00> : vector<8x128xf32>
    %155 = tpu.matmul %153, %7, %cst_39 {dimension_numbers = #tpu.dot_dimension_numbers<[1], [0], [0], [1], [0, 0, 1, 1], [], []>} : vector<8x32xf32>, vector<32x128xf32>, vector<8x128xf32> -> vector<8x128xf32>
    %156 = arith.addf %154, %155 : vector<8x128xf32>
    %157 = arith.negf %156 : vector<8x128xf32>
    %158 = math.exp %157 : vector<8x128xf32>
    %cst_40 = arith.constant 1.000000e+00 : f32
    %159 = vector.broadcast %cst_40 : f32 to vector<8x128xf32>
    %160 = arith.addf %159, %158 : vector<8x128xf32>
    %161 = arith.divf %159, %160 : vector<8x128xf32>
    %162 = vector.extract_strided_slice %161 {offsets = [0, 0], sizes = [8, 32], strides = [1, 1]} : vector<8x128xf32> to vector<8x32xf32>
    %163 = vector.extract_strided_slice %161 {offsets = [0, 32], sizes = [8, 32], strides = [1, 1]} : vector<8x128xf32> to vector<8x32xf32>
    %164 = vector.extract_strided_slice %161 {offsets = [0, 96], sizes = [8, 32], strides = [1, 1]} : vector<8x128xf32> to vector<8x32xf32>
    %165 = vector.extract_strided_slice %156 {offsets = [0, 64], sizes = [8, 32], strides = [1, 1]} : vector<8x128xf32> to vector<8x32xf32>
    %166 = math.tanh %165 : vector<8x32xf32>
    %167 = arith.mulf %163, %151 : vector<8x32xf32>
    %168 = arith.mulf %162, %166 : vector<8x32xf32>
    %169 = arith.addf %167, %168 : vector<8x32xf32>
    %170 = math.tanh %169 : vector<8x32xf32>
    %171 = arith.mulf %164, %170 : vector<8x32xf32>
    %c72 = arith.constant 72 : index
    %c0_41 = arith.constant 0 : index
    %172 = vector.load %arg9[%c72, %c0_41] : memref<128x128xf32, #tpu.memory_space<vmem>>, vector<8x128xf32>
    %cst_42 = arith.constant dense<0.000000e+00> : vector<8x128xf32>
    %173 = tpu.matmul %171, %7, %cst_42 {dimension_numbers = #tpu.dot_dimension_numbers<[1], [0], [0], [1], [0, 0, 1, 1], [], []>} : vector<8x32xf32>, vector<32x128xf32>, vector<8x128xf32> -> vector<8x128xf32>
    %174 = arith.addf %172, %173 : vector<8x128xf32>
    %175 = arith.negf %174 : vector<8x128xf32>
    %176 = math.exp %175 : vector<8x128xf32>
    %cst_43 = arith.constant 1.000000e+00 : f32
    %177 = vector.broadcast %cst_43 : f32 to vector<8x128xf32>
    %178 = arith.addf %177, %176 : vector<8x128xf32>
    %179 = arith.divf %177, %178 : vector<8x128xf32>
    %180 = vector.extract_strided_slice %179 {offsets = [0, 0], sizes = [8, 32], strides = [1, 1]} : vector<8x128xf32> to vector<8x32xf32>
    %181 = vector.extract_strided_slice %179 {offsets = [0, 32], sizes = [8, 32], strides = [1, 1]} : vector<8x128xf32> to vector<8x32xf32>
    %182 = vector.extract_strided_slice %179 {offsets = [0, 96], sizes = [8, 32], strides = [1, 1]} : vector<8x128xf32> to vector<8x32xf32>
    %183 = vector.extract_strided_slice %174 {offsets = [0, 64], sizes = [8, 32], strides = [1, 1]} : vector<8x128xf32> to vector<8x32xf32>
    %184 = math.tanh %183 : vector<8x32xf32>
    %185 = arith.mulf %181, %169 : vector<8x32xf32>
    %186 = arith.mulf %180, %184 : vector<8x32xf32>
    %187 = arith.addf %185, %186 : vector<8x32xf32>
    %188 = math.tanh %187 : vector<8x32xf32>
    %189 = arith.mulf %182, %188 : vector<8x32xf32>
    %c80 = arith.constant 80 : index
    %c0_44 = arith.constant 0 : index
    %190 = vector.load %arg9[%c80, %c0_44] : memref<128x128xf32, #tpu.memory_space<vmem>>, vector<8x128xf32>
    %cst_45 = arith.constant dense<0.000000e+00> : vector<8x128xf32>
    %191 = tpu.matmul %189, %7, %cst_45 {dimension_numbers = #tpu.dot_dimension_numbers<[1], [0], [0], [1], [0, 0, 1, 1], [], []>} : vector<8x32xf32>, vector<32x128xf32>, vector<8x128xf32> -> vector<8x128xf32>
    %192 = arith.addf %190, %191 : vector<8x128xf32>
    %193 = arith.negf %192 : vector<8x128xf32>
    %194 = math.exp %193 : vector<8x128xf32>
    %cst_46 = arith.constant 1.000000e+00 : f32
    %195 = vector.broadcast %cst_46 : f32 to vector<8x128xf32>
    %196 = arith.addf %195, %194 : vector<8x128xf32>
    %197 = arith.divf %195, %196 : vector<8x128xf32>
    %198 = vector.extract_strided_slice %197 {offsets = [0, 0], sizes = [8, 32], strides = [1, 1]} : vector<8x128xf32> to vector<8x32xf32>
    %199 = vector.extract_strided_slice %197 {offsets = [0, 32], sizes = [8, 32], strides = [1, 1]} : vector<8x128xf32> to vector<8x32xf32>
    %200 = vector.extract_strided_slice %197 {offsets = [0, 96], sizes = [8, 32], strides = [1, 1]} : vector<8x128xf32> to vector<8x32xf32>
    %201 = vector.extract_strided_slice %192 {offsets = [0, 64], sizes = [8, 32], strides = [1, 1]} : vector<8x128xf32> to vector<8x32xf32>
    %202 = math.tanh %201 : vector<8x32xf32>
    %203 = arith.mulf %199, %187 : vector<8x32xf32>
    %204 = arith.mulf %198, %202 : vector<8x32xf32>
    %205 = arith.addf %203, %204 : vector<8x32xf32>
    %206 = math.tanh %205 : vector<8x32xf32>
    %207 = arith.mulf %200, %206 : vector<8x32xf32>
    %c88 = arith.constant 88 : index
    %c0_47 = arith.constant 0 : index
    %208 = vector.load %arg9[%c88, %c0_47] : memref<128x128xf32, #tpu.memory_space<vmem>>, vector<8x128xf32>
    %cst_48 = arith.constant dense<0.000000e+00> : vector<8x128xf32>
    %209 = tpu.matmul %207, %7, %cst_48 {dimension_numbers = #tpu.dot_dimension_numbers<[1], [0], [0], [1], [0, 0, 1, 1], [], []>} : vector<8x32xf32>, vector<32x128xf32>, vector<8x128xf32> -> vector<8x128xf32>
    %210 = arith.addf %208, %209 : vector<8x128xf32>
    %211 = arith.negf %210 : vector<8x128xf32>
    %212 = math.exp %211 : vector<8x128xf32>
    %cst_49 = arith.constant 1.000000e+00 : f32
    %213 = vector.broadcast %cst_49 : f32 to vector<8x128xf32>
    %214 = arith.addf %213, %212 : vector<8x128xf32>
    %215 = arith.divf %213, %214 : vector<8x128xf32>
    %216 = vector.extract_strided_slice %215 {offsets = [0, 0], sizes = [8, 32], strides = [1, 1]} : vector<8x128xf32> to vector<8x32xf32>
    %217 = vector.extract_strided_slice %215 {offsets = [0, 32], sizes = [8, 32], strides = [1, 1]} : vector<8x128xf32> to vector<8x32xf32>
    %218 = vector.extract_strided_slice %215 {offsets = [0, 96], sizes = [8, 32], strides = [1, 1]} : vector<8x128xf32> to vector<8x32xf32>
    %219 = vector.extract_strided_slice %210 {offsets = [0, 64], sizes = [8, 32], strides = [1, 1]} : vector<8x128xf32> to vector<8x32xf32>
    %220 = math.tanh %219 : vector<8x32xf32>
    %221 = arith.mulf %217, %205 : vector<8x32xf32>
    %222 = arith.mulf %216, %220 : vector<8x32xf32>
    %223 = arith.addf %221, %222 : vector<8x32xf32>
    %224 = math.tanh %223 : vector<8x32xf32>
    %225 = arith.mulf %218, %224 : vector<8x32xf32>
    %c96 = arith.constant 96 : index
    %c0_50 = arith.constant 0 : index
    %226 = vector.load %arg9[%c96, %c0_50] : memref<128x128xf32, #tpu.memory_space<vmem>>, vector<8x128xf32>
    %cst_51 = arith.constant dense<0.000000e+00> : vector<8x128xf32>
    %227 = tpu.matmul %225, %7, %cst_51 {dimension_numbers = #tpu.dot_dimension_numbers<[1], [0], [0], [1], [0, 0, 1, 1], [], []>} : vector<8x32xf32>, vector<32x128xf32>, vector<8x128xf32> -> vector<8x128xf32>
    %228 = arith.addf %226, %227 : vector<8x128xf32>
    %229 = arith.negf %228 : vector<8x128xf32>
    %230 = math.exp %229 : vector<8x128xf32>
    %cst_52 = arith.constant 1.000000e+00 : f32
    %231 = vector.broadcast %cst_52 : f32 to vector<8x128xf32>
    %232 = arith.addf %231, %230 : vector<8x128xf32>
    %233 = arith.divf %231, %232 : vector<8x128xf32>
    %234 = vector.extract_strided_slice %233 {offsets = [0, 0], sizes = [8, 32], strides = [1, 1]} : vector<8x128xf32> to vector<8x32xf32>
    %235 = vector.extract_strided_slice %233 {offsets = [0, 32], sizes = [8, 32], strides = [1, 1]} : vector<8x128xf32> to vector<8x32xf32>
    %236 = vector.extract_strided_slice %233 {offsets = [0, 96], sizes = [8, 32], strides = [1, 1]} : vector<8x128xf32> to vector<8x32xf32>
    %237 = vector.extract_strided_slice %228 {offsets = [0, 64], sizes = [8, 32], strides = [1, 1]} : vector<8x128xf32> to vector<8x32xf32>
    %238 = math.tanh %237 : vector<8x32xf32>
    %239 = arith.mulf %235, %223 : vector<8x32xf32>
    %240 = arith.mulf %234, %238 : vector<8x32xf32>
    %241 = arith.addf %239, %240 : vector<8x32xf32>
    %242 = math.tanh %241 : vector<8x32xf32>
    %243 = arith.mulf %236, %242 : vector<8x32xf32>
    %c104 = arith.constant 104 : index
    %c0_53 = arith.constant 0 : index
    %244 = vector.load %arg9[%c104, %c0_53] : memref<128x128xf32, #tpu.memory_space<vmem>>, vector<8x128xf32>
    %cst_54 = arith.constant dense<0.000000e+00> : vector<8x128xf32>
    %245 = tpu.matmul %243, %7, %cst_54 {dimension_numbers = #tpu.dot_dimension_numbers<[1], [0], [0], [1], [0, 0, 1, 1], [], []>} : vector<8x32xf32>, vector<32x128xf32>, vector<8x128xf32> -> vector<8x128xf32>
    %246 = arith.addf %244, %245 : vector<8x128xf32>
    %247 = arith.negf %246 : vector<8x128xf32>
    %248 = math.exp %247 : vector<8x128xf32>
    %cst_55 = arith.constant 1.000000e+00 : f32
    %249 = vector.broadcast %cst_55 : f32 to vector<8x128xf32>
    %250 = arith.addf %249, %248 : vector<8x128xf32>
    %251 = arith.divf %249, %250 : vector<8x128xf32>
    %252 = vector.extract_strided_slice %251 {offsets = [0, 0], sizes = [8, 32], strides = [1, 1]} : vector<8x128xf32> to vector<8x32xf32>
    %253 = vector.extract_strided_slice %251 {offsets = [0, 32], sizes = [8, 32], strides = [1, 1]} : vector<8x128xf32> to vector<8x32xf32>
    %254 = vector.extract_strided_slice %251 {offsets = [0, 96], sizes = [8, 32], strides = [1, 1]} : vector<8x128xf32> to vector<8x32xf32>
    %255 = vector.extract_strided_slice %246 {offsets = [0, 64], sizes = [8, 32], strides = [1, 1]} : vector<8x128xf32> to vector<8x32xf32>
    %256 = math.tanh %255 : vector<8x32xf32>
    %257 = arith.mulf %253, %241 : vector<8x32xf32>
    %258 = arith.mulf %252, %256 : vector<8x32xf32>
    %259 = arith.addf %257, %258 : vector<8x32xf32>
    %260 = math.tanh %259 : vector<8x32xf32>
    %261 = arith.mulf %254, %260 : vector<8x32xf32>
    %c112 = arith.constant 112 : index
    %c0_56 = arith.constant 0 : index
    %262 = vector.load %arg9[%c112, %c0_56] : memref<128x128xf32, #tpu.memory_space<vmem>>, vector<8x128xf32>
    %cst_57 = arith.constant dense<0.000000e+00> : vector<8x128xf32>
    %263 = tpu.matmul %261, %7, %cst_57 {dimension_numbers = #tpu.dot_dimension_numbers<[1], [0], [0], [1], [0, 0, 1, 1], [], []>} : vector<8x32xf32>, vector<32x128xf32>, vector<8x128xf32> -> vector<8x128xf32>
    %264 = arith.addf %262, %263 : vector<8x128xf32>
    %265 = arith.negf %264 : vector<8x128xf32>
    %266 = math.exp %265 : vector<8x128xf32>
    %cst_58 = arith.constant 1.000000e+00 : f32
    %267 = vector.broadcast %cst_58 : f32 to vector<8x128xf32>
    %268 = arith.addf %267, %266 : vector<8x128xf32>
    %269 = arith.divf %267, %268 : vector<8x128xf32>
    %270 = vector.extract_strided_slice %269 {offsets = [0, 0], sizes = [8, 32], strides = [1, 1]} : vector<8x128xf32> to vector<8x32xf32>
    %271 = vector.extract_strided_slice %269 {offsets = [0, 32], sizes = [8, 32], strides = [1, 1]} : vector<8x128xf32> to vector<8x32xf32>
    %272 = vector.extract_strided_slice %269 {offsets = [0, 96], sizes = [8, 32], strides = [1, 1]} : vector<8x128xf32> to vector<8x32xf32>
    %273 = vector.extract_strided_slice %264 {offsets = [0, 64], sizes = [8, 32], strides = [1, 1]} : vector<8x128xf32> to vector<8x32xf32>
    %274 = math.tanh %273 : vector<8x32xf32>
    %275 = arith.mulf %271, %259 : vector<8x32xf32>
    %276 = arith.mulf %270, %274 : vector<8x32xf32>
    %277 = arith.addf %275, %276 : vector<8x32xf32>
    %278 = math.tanh %277 : vector<8x32xf32>
    %279 = arith.mulf %272, %278 : vector<8x32xf32>
    %c120 = arith.constant 120 : index
    %c0_59 = arith.constant 0 : index
    %280 = vector.load %arg9[%c120, %c0_59] : memref<128x128xf32, #tpu.memory_space<vmem>>, vector<8x128xf32>
    %cst_60 = arith.constant dense<0.000000e+00> : vector<8x128xf32>
    %281 = tpu.matmul %279, %7, %cst_60 {dimension_numbers = #tpu.dot_dimension_numbers<[1], [0], [0], [1], [0, 0, 1, 1], [], []>} : vector<8x32xf32>, vector<32x128xf32>, vector<8x128xf32> -> vector<8x128xf32>
    %282 = arith.addf %280, %281 : vector<8x128xf32>
    %283 = arith.negf %282 : vector<8x128xf32>
    %284 = math.exp %283 : vector<8x128xf32>
    %cst_61 = arith.constant 1.000000e+00 : f32
    %285 = vector.broadcast %cst_61 : f32 to vector<8x128xf32>
    %286 = arith.addf %285, %284 : vector<8x128xf32>
    %287 = arith.divf %285, %286 : vector<8x128xf32>
    %288 = vector.extract_strided_slice %287 {offsets = [0, 0], sizes = [8, 32], strides = [1, 1]} : vector<8x128xf32> to vector<8x32xf32>
    %289 = vector.extract_strided_slice %287 {offsets = [0, 32], sizes = [8, 32], strides = [1, 1]} : vector<8x128xf32> to vector<8x32xf32>
    %290 = vector.extract_strided_slice %287 {offsets = [0, 96], sizes = [8, 32], strides = [1, 1]} : vector<8x128xf32> to vector<8x32xf32>
    %291 = vector.extract_strided_slice %282 {offsets = [0, 64], sizes = [8, 32], strides = [1, 1]} : vector<8x128xf32> to vector<8x32xf32>
    %292 = math.tanh %291 : vector<8x32xf32>
    %293 = arith.mulf %289, %277 : vector<8x32xf32>
    %294 = arith.mulf %288, %292 : vector<8x32xf32>
    %295 = arith.addf %293, %294 : vector<8x32xf32>
    %296 = math.tanh %295 : vector<8x32xf32>
    %297 = arith.mulf %290, %296 : vector<8x32xf32>
    %c0_62 = arith.constant 0 : index
    %c0_63 = arith.constant 0 : index
    %298 = vector.load %arg6[%c0_62, %c0_63] : memref<32x128xf32, #tpu.memory_space<vmem>>, vector<32x128xf32>
    %cst_64 = arith.constant dense<0.000000e+00> : vector<8x128xf32>
    %299 = tpu.matmul %297, %298, %cst_64 {dimension_numbers = #tpu.dot_dimension_numbers<[1], [0], [0], [1], [0, 0, 1, 1], [], []>} : vector<8x32xf32>, vector<32x128xf32>, vector<8x128xf32> -> vector<8x128xf32>
    %c0_65 = arith.constant 0 : index
    %c0_66 = arith.constant 0 : index
    %300 = vector.load %arg7[%c0_65, %c0_66] : memref<1x128xf32, #tpu.memory_space<vmem>>, vector<1x128xf32>
    %301 = vector.broadcast %300 : vector<1x128xf32> to vector<8x128xf32>
    %302 = arith.addf %299, %301 : vector<8x128xf32>
    %c0_67 = arith.constant 0 : index
    %c0_68 = arith.constant 0 : index
    %303 = vector.load %arg8[%c0_67, %c0_68] : memref<8x128xf32, #tpu.memory_space<vmem>>, vector<8x128xf32>
    tpu.vector_store %arg8[%c0_67, %c0_68], %302 {strides = array<i32>} : memref<8x128xf32, #tpu.memory_space<vmem>>, vector<8x128xf32>,
    return
  }
}

</mosaic_0001>

<bundles_post_ra>
// kernel: tpu_custom_call.1
= control target key start
LH: loop header
LB: loop body
LE: loop exit
PB: predicated region body
PF: predicated region fallthrough
CT: control target
= control target key end

     0   :  { %vm100_vm0 = vcmask 1043456   ;;  %vm51_vm1 = vcmask 31744   ;;  %s1832_s0 = inlined_call_operand.vmem [shape: f32[128,4], index: 0, kind: input, shape index: {}]   ;;  %s1833_s1 = inlined_call_operand.vmem [shape: f32[8,32], index: 1, kind: input, shape index: {}]   ;;  %s1834_s2 = inlined_call_operand.vmem [shape: f32[8,32], index: 2, kind: input, shape index: {}]   ;;  %s1835_s3 = inlined_call_operand.vmem [shape: f32[4,128], index: 3, kind: input, shape index: {}]   ;;  %s1836_s4 = inlined_call_operand.vmem [shape: f32[1,128], index: 4, kind: input, shape index: {}]   ;;  %s1837_s5 = inlined_call_operand.vmem [shape: f32[32,128], index: 5, kind: input, shape index: {}]   ;;  %s1838_s6 = inlined_call_operand.vmem [shape: f32[32,128], index: 6, kind: input, shape index: {}]   ;;  %s1839_s7 = inlined_call_operand.vmem [shape: f32[1,128], index: 7, kind: input, shape index: {}]   ;;  %s1840_s8 = inlined_call_operand.hbm [shape: f32[8,128], index: 8, kind: output, shape index: {}]  }
   0x1   :  { %v46_v0 = vld [vmem:[%s1835_s3] sm:$0xf]  ;;  %v39_v1 = vld [vmem:[%s1832_s0 + $0x48] sm:$0xff]  ;;  %v1537_v2 = vld [vmem:[%s1837_s5 + $0x18] sm:$0xff] }
   0x2   :  { %1318 = vmatpush.msk.msra.mxu1 %vm100_vm0, %v46_v0  ;;  %1268 = vmatpush.msk.msra.mxu0 %vm100_vm0, %v46_v0  ;;  %v1543_v3 = vld [vmem:[%s1837_s5 + $0x10] sm:$0xff]  ;;  %v30_v4 = vld [vmem:[%s1832_s0] sm:$0xff]  ;;  %v1554_v5 = vld [vmem:[%s1837_s5 + $0x8] sm:$0xff] }
   0x3   :  { %1278 = vmatmul.msk.f32.vlgmr.msra.gmra.mxu1 %vm51_vm1, %v39_v1  ;;  %276 = vmatpush.msra.mxu2 %v1537_v2 }
   0x4   :  { %208 = vmatpush.msrb.mxu1 %v1537_v2  ;;  %1269 = vmatmul.msk.f32.vlgmr.msra.gmra.mxu0 %vm51_vm1, %v30_v4 }
   0x5   :  { %277 = vmatpush.msra.mxu2 %v1543_v3  ;;  %1319 = vmatpush.msk.msra.mxu3 %vm100_vm0, %v46_v0 }
   0x6   :  { %13 = vsyncpa [#allocation4], 0  ;;  %209 = vmatpush.msrb.mxu1 %v1543_v3  ;;  %v1562_v6 = vld [vmem:[%s1837_s5] sm:$0xff]  ;;  %v40_v7 = vld [vmem:[%s1832_s0 + $0x50] sm:$0xff]  ;;  %vm192_vm2 = vcmask 261120   ;;  %s1480_s24 = smov 64  }
   0x7   :  { %340 = vmatpush.msrb.mxu3 %v1537_v2  ;;  %278 = vmatpush.msra.mxu2 %v1554_v5  ;;  %v41_v8 = vld [vmem:[%s1832_s0 + $0x58] sm:$0xff]  ;;  %v189_v9 = vld [vmem:[%s1833_s1] sm:$0xff]  ;;  %s1481_s27 = smov 32   ;;  %v31_v42 = vld [vmem:[%s1832_s0 + $0x8] sm:$0xff]  ;;  %s1482_s13 = smov [#allocation3]  }
   0x8   :  { %210 = vmatpush.msrb.mxu1 %v1554_v5  ;;  %v1604_v14 = vld [vmem:[%s1836_s4] ss:$0 sm:$0xff]  ;;  %s1257_s14 = sshll.u32 %s1482_s13, 4  ;;  %s1259_s17 = sshll.u32 %s1840_s8, 4  ;;  %s1258_s14 = int_to_ptr.vmem [resolvable:$true] %s1257_s14  ;;  %s1260_s17 = int_to_ptr.hbm [resolvable:$true] %s1259_s17 }
   0x9   :  { %341 = vmatpush.msrb.mxu3 %v1543_v3  ;;  %279 = vmatpush.msra.mxu2 %v1562_v6  ;;  %v190_v19 = vld [vmem:[%s1834_s2] sm:$0xff] }
   0xa   :  { %211 = vmatpush.msrb.mxu1 %v1562_v6 }
   0xb   :  { %342 = vmatpush.msrb.mxu3 %v1554_v5  ;;  %1279 = vmatmul.msk.f32.gmra.mxu1 %vm51_vm1, %v40_v7 }
   0xc   :  { %468 = vmatpush.msrb.mxu2 %v1537_v2  ;;  %404 = vmatpush.msra.mxu1 %v1537_v2 }
   0xd   :  { %343 = vmatpush.msrb.mxu3 %v1562_v6  ;;  %1270 = vmatmul.msk.f32.gmra.mxu0 %vm51_vm1, %v31_v42 }
   0xe   :  { %469 = vmatpush.msrb.mxu2 %v1543_v3  ;;  %405 = vmatpush.msra.mxu1 %v1543_v3 }
  0x10   :  { %470 = vmatpush.msrb.mxu2 %v1554_v5  ;;  %406 = vmatpush.msra.mxu1 %v1554_v5 }
  0x12   :  { %471 = vmatpush.msrb.mxu2 %v1562_v6  ;;  %407 = vmatpush.msra.mxu1 %v1562_v6 }
  0x13   :  { %1280 = vmatmul.msk.f32.gmra.mxu1 %vm51_vm1, %v41_v8  ;;  %v42_v8 = vld [vmem:[%s1832_s0 + $0x60] sm:$0xff] }
  0x14   :  { %1281 = vmatmul.msk.f32.vlgmr.msra.gmra.mxu3 %vm51_vm1, %v42_v8 }
  0x15   :  { %532 = vmatpush.msra.mxu3 %v1537_v2 }
  0x17   :  { %533 = vmatpush.msra.mxu3 %v1543_v3 }
  0x19   :  { %534 = vmatpush.msra.mxu3 %v1554_v5 }
  0x1b   :  { %1285 = vmatmul.msk.f32.vlgmr.msrb.gmra.mxu1 %vm192_vm2, %v189_v9  ;;  %v43_v9 = vld [vmem:[%s1832_s0 + $0x68] sm:$0xff]  ;;  %535 = vmatpush.msra.mxu3 %v1562_v6 }
  0x1c   :  { %596 = vmatpush.msrb.mxu1 %v1537_v2  ;;  %1282 = vmatmul.msk.f32.gmra.mxu3 %vm51_vm1, %v43_v9 }
  0x1e   :  { %597 = vmatpush.msrb.mxu1 %v1543_v3 }
  0x20   :  { %598 = vmatpush.msrb.mxu1 %v1554_v5 }
  0x22   :  { %599 = vmatpush.msrb.mxu1 %v1562_v6 }
  0x80   :  { %v1595_v10 = vpop.f32.mrf.mxu1 }
  0x81   :  { %v121_v13 = vpop.f32.mrf.mxu0 }
  0x82   :  { %v122_v15 = vadd.f32 %v1604_v14, %v121_v13  ;;  %v44_v13 = vld [vmem:[%s1832_s0 + $0x70] sm:$0xff] }
  0x83   :  { %1283 = vmatmul.msk.f32.gmra.mxu3 %vm51_vm1, %v44_v13 }
  0x88   :  { %v1597_v11 = vpop.f32.mrf.mxu1 }
  0x8a   :  { %v124_v44 = vpop.f32.mrf.mxu0 }
  0x8b   :  { %v125_v45 = vadd.f32 %v1604_v14, %v124_v44 }
  0x90   :  { %v1599_v12 = vpop.f32.mrf.mxu1 }
  0x98   :  { %v213_v16 = vpop.f32.mrf.mxu1 }
  0x99   :  { %v216_v17 = vadd.f32 %v213_v16, %v122_v15  ;;  %v45_v15 = vld [vmem:[%s1832_s0 + $0x78] sm:$0xff] }
  0x9a   :  { %1284 = vmatmul.msk.f32.gmra.mxu3 %vm51_vm1, %v45_v15 }
  0x9b   :  { %1325 = vtanh.f32 %v216_v17  ;;  %v1286_v20 = vmul.f32 -1.442695, %v216_v17 }
  0x9d   :  { %1327 = vpow2.f32 %v1286_v20  ;;  %v1658_v20 = vpop.f32.mrf.mxu3 }
  0xa1   :  { %v1326_v18 = vpop.eup %1325 }
  0xa2   :  { %243 = vrot.lane.b32.xlu0 %v1326_v18, %s1480_s24  ;;  %v32_v18 = vld [vmem:[%s1832_s0 + $0x10] sm:$0xff] }
  0xa3   :  { %v1328_v21 = vpop.eup %1327  ;;  %1271 = vmatmul.msk.f32.gmra.mxu0 %vm51_vm1, %v32_v18 }
  0xa4   :  { %v220_v22 = vadd.f32 1.0, %v1328_v21 }
  0xa5   :  { %v1660_v21 = vpop.f32.mrf.mxu3 }
  0xa6   :  { %1329 = vrcp.f32 %v220_v22  ;;  %v232_v28 = vand.u32 2147483648, %v220_v22  ;;  %vm226_vm4 = vweird.f32 %v220_v22  ;;  %v230_v29 = vand.u32 2147483647, %v220_v22 }
  0xa8   :  { %v233_v31 = vor.u32 1.1754944e-38, %v232_v28  ;;  %vm231_vm6 = vcmp.eq.f32.partialorder %v230_v29, 8.507059e+37 }
  0xaa   :  { %238 = vrot.lane.b32.xlu0 %v190_v19, %s1481_s27 }
  0xac   :  { %v1330_v23 = vpop.eup %1329 }
  0xad   :  { %v222_v24 = vmul.f32 %v1330_v23, %v220_v22  ;;  %vm227_vm3 = vweird.f32 %v1330_v23 }
  0xae   :  { %vm228_vm5 = vmor %vm226_vm4, %vm227_vm3 }
  0xaf   :  { %v223_v25 = vsub.f32 1.0, %v222_v24 }
  0xb1   :  { %v224_v26 = vmul.f32 %v1330_v23, %v223_v25 }
  0xb3   :  { %v225_v27 = vadd.f32 %v1330_v23, %v224_v26 }
  0xb5   :  { %v229_v30 = vsel %vm228_vm5, %v1330_v23, %v225_v27 }
  0xb6   :  { %v234_v33 = vsel %vm231_vm6, %v233_v31, %v229_v30 }
 0x106   :  { %v1662_v22 = vpop.f32.mrf.mxu3 }
 0x114   :  { %v244_v32 = vpop.permute.xlu0 %243 }
 0x115   :  { %v246_v34 = vmul.f32 %v244_v32, %v234_v33 }
 0x117   :  { %248 = vrot.lane.b32.xlu1 %v246_v34, %s1481_s27 }
 0x11c   :  { %v239_v35 = vpop.permute.xlu0 %238 }
 0x11d   :  { %v241_v36 = vmul.f32 %v239_v35, %v234_v33  ;;  %v1664_v23 = vpop.f32.mrf.mxu3 }
 0x120   :  { %v127_v24 = vpop.f32.mrf.mxu0 }
 0x121   :  { %v128_v25 = vadd.f32 %v1604_v14, %v127_v24 }
 0x189   :  { %v249_v37 = vpop.permute.xlu1 %248 }
 0x18a   :  { %v251_v38 = vadd.f32 %v249_v37, %v241_v36 }
 0x18c   :  { %1331 = vtanh.f32 %v251_v38 }
 0x192   :  { %v1332_v39 = vpop.eup %1331 }
 0x193   :  { %254 = vrot.lane.b32.xlu1 %v1332_v39, %s1480_s24 }
 0x205   :  { %v255_v40 = vpop.permute.xlu1 %254 }
 0x206   :  { %v257_v41 = vmul.f32 %v255_v40, %v234_v33 }
 0x208   :  { %260 = vrot.lane.b32.xlu2 %v257_v41, %s1481_s27 }
 0x262   :  { %v261_v43 = vpop.permute.xlu2 %260 }
 0x263   :  { %1287 = vmatmul.msk.f32.vlgmr.msra.gmra.mxu2 %vm192_vm2, %v261_v43 }
 0x264   :  { %660 = vmatpush.msra.mxu2 %v1537_v2 }
 0x266   :  { %661 = vmatpush.msra.mxu2 %v1543_v3 }
 0x268   :  { %662 = vmatpush.msra.mxu2 %v1554_v5 }
 0x26a   :  { %663 = vmatpush.msra.mxu2 %v1562_v6 }
 0x2e6   :  { %v281_v46 = vpop.f32.mrf.mxu2 }
 0x2e7   :  { %v284_v47 = vadd.f32 %v281_v46, %v125_v45 }
 0x2e9   :  { %1333 = vtanh.f32 %v284_v47  ;;  %v1288_v49 = vmul.f32 -1.442695, %v284_v47 }
 0x2eb   :  { %1335 = vpow2.f32 %v1288_v49 }
 0x2ef   :  { %v1334_v48 = vpop.eup %1333 }
 0x2f0   :  { %307 = vrot.lane.b32.xlu2 %v1334_v48, %s1480_s24  ;;  %v33_v48 = vld [vmem:[%s1832_s0 + $0x18] sm:$0xff] }
 0x2f1   :  { %v1336_v50 = vpop.eup %1335  ;;  %1272 = vmatmul.msk.f32.gmra.mxu0 %vm51_vm1, %v33_v48 }
 0x2f2   :  { %v288_v51 = vadd.f32 1.0, %v1336_v50 }
 0x2f4   :  { %1337 = vrcp.f32 %v288_v51  ;;  %v300_v57 = vand.u32 2147483648, %v288_v51  ;;  %vm294_vm8 = vweird.f32 %v288_v51  ;;  %v298_v58 = vand.u32 2147483647, %v288_v51 }
 0x2f6   :  { %v301_v60 = vor.u32 1.1754944e-38, %v300_v57  ;;  %vm299_vm10 = vcmp.eq.f32.partialorder %v298_v58, 8.507059e+37 }
 0x2fa   :  { %v1338_v52 = vpop.eup %1337 }
 0x2fb   :  { %v290_v53 = vmul.f32 %v1338_v52, %v288_v51  ;;  %vm295_vm7 = vweird.f32 %v1338_v52 }
 0x2fc   :  { %vm296_vm9 = vmor %vm294_vm8, %vm295_vm7 }
 0x2fd   :  { %v291_v54 = vsub.f32 1.0, %v290_v53 }
 0x2ff   :  { %v292_v55 = vmul.f32 %v1338_v52, %v291_v54 }
 0x301   :  { %v293_v56 = vadd.f32 %v1338_v52, %v292_v55 }
 0x303   :  { %v297_v59 = vsel %vm296_vm9, %v1338_v52, %v293_v56 }
 0x304   :  { %v302_v62 = vsel %vm299_vm10, %v301_v60, %v297_v59 }
 0x305   :  { %v305_v0 = vmul.f32 %v302_v62, %v251_v38 }
 0x34a   :  { %v308_v61 = vpop.permute.xlu2 %307 }
 0x34b   :  { %v310_v63 = vmul.f32 %v308_v61, %v302_v62 }
 0x34d   :  { %312 = vrot.lane.b32.xlu0 %v310_v63, %s1481_s27 }
 0x36e   :  { %v130_v52 = vpop.f32.mrf.mxu0 }
 0x36f   :  { %v131_v53 = vadd.f32 %v1604_v14, %v130_v52 }
 0x3bf   :  { %v313_v1 = vpop.permute.xlu0 %312 }
 0x3c0   :  { %v315_v4 = vadd.f32 %v313_v1, %v305_v0 }
 0x3c2   :  { %1339 = vtanh.f32 %v315_v4 }
 0x3c8   :  { %v1340_v7 = vpop.eup %1339 }
 0x3c9   :  { %318 = vrot.lane.b32.xlu1 %v1340_v7, %s1480_s24 }
 0x43b   :  { %v319_v16 = vpop.permute.xlu1 %318 }
 0x43c   :  { %v321_v17 = vmul.f32 %v319_v16, %v302_v62 }
 0x43e   :  { %324 = vrot.lane.b32.xlu2 %v321_v17, %s1481_s27 }
 0x498   :  { %v325_v19 = vpop.permute.xlu2 %324 }
 0x499   :  { %1289 = vmatmul.msk.f32.vlgmr.msrb.gmra.mxu3 %vm192_vm2, %v325_v19 }
 0x49a   :  { %724 = vmatpush.msrb.mxu3 %v1537_v2 }
 0x49c   :  { %725 = vmatpush.msrb.mxu3 %v1543_v3 }
 0x49e   :  { %726 = vmatpush.msrb.mxu3 %v1554_v5 }
 0x4a0   :  { %727 = vmatpush.msrb.mxu3 %v1562_v6 }
 0x51c   :  { %v345_v26 = vpop.f32.mrf.mxu3 }
 0x51d   :  { %v348_v27 = vadd.f32 %v345_v26, %v128_v25  ;;  %v34_v26 = vld [vmem:[%s1832_s0 + $0x20] sm:$0xff] }
 0x51e   :  { %1273 = vmatmul.msk.f32.gmra.mxu0 %vm51_vm1, %v34_v26 }
 0x51f   :  { %1341 = vtanh.f32 %v348_v27  ;;  %v1290_v29 = vmul.f32 -1.442695, %v348_v27 }
 0x521   :  { %1343 = vpow2.f32 %v1290_v29 }
 0x525   :  { %v1342_v28 = vpop.eup %1341 }
 0x526   :  { %371 = vrot.lane.b32.xlu0 %v1342_v28, %s1480_s24 }
 0x527   :  { %v1344_v30 = vpop.eup %1343 }
 0x528   :  { %v352_v31 = vadd.f32 1.0, %v1344_v30 }
 0x52a   :  { %1345 = vrcp.f32 %v352_v31  ;;  %v364_v37 = vand.u32 2147483648, %v352_v31  ;;  %vm358_vm12 = vweird.f32 %v352_v31  ;;  %v362_v38 = vand.u32 2147483647, %v352_v31 }
 0x52c   :  { %v365_v40 = vor.u32 1.1754944e-38, %v364_v37  ;;  %vm363_vm14 = vcmp.eq.f32.partialorder %v362_v38, 8.507059e+37 }
 0x530   :  { %v1346_v32 = vpop.eup %1345 }
 0x531   :  { %v354_v33 = vmul.f32 %v1346_v32, %v352_v31  ;;  %vm359_vm11 = vweird.f32 %v1346_v32 }
 0x532   :  { %vm360_vm13 = vmor %vm358_vm12, %vm359_vm11 }
 0x533   :  { %v355_v34 = vsub.f32 1.0, %v354_v33 }
 0x535   :  { %v356_v35 = vmul.f32 %v1346_v32, %v355_v34 }
 0x537   :  { %v357_v36 = vadd.f32 %v1346_v32, %v356_v35 }
 0x539   :  { %v361_v39 = vsel %vm360_vm13, %v1346_v32, %v357_v36 }
 0x53a   :  { %v366_v42 = vsel %vm363_vm14, %v365_v40, %v361_v39 }
 0x53b   :  { %v369_v44 = vmul.f32 %v366_v42, %v315_v4 }
 0x598   :  { %v372_v41 = vpop.permute.xlu0 %371 }
 0x599   :  { %v374_v43 = vmul.f32 %v372_v41, %v366_v42 }
 0x59b   :  { %376 = vrot.lane.b32.xlu1 %v374_v43, %s1481_s27  ;;  %v133_v28 = vpop.f32.mrf.mxu0 }
 0x59c   :  { %v134_v29 = vadd.f32 %v1604_v14, %v133_v28  ;;  %v36_v28 = vld [vmem:[%s1832_s0 + $0x30] sm:$0xff] }
 0x60d   :  { %v377_v45 = vpop.permute.xlu1 %376 }
 0x60e   :  { %v379_v46 = vadd.f32 %v377_v45, %v369_v44 }
 0x610   :  { %1347 = vtanh.f32 %v379_v46 }
 0x616   :  { %v1348_v47 = vpop.eup %1347 }
 0x617   :  { %382 = vrot.lane.b32.xlu2 %v1348_v47, %s1480_s24 }
 0x671   :  { %v383_v49 = vpop.permute.xlu2 %382 }
 0x672   :  { %v385_v50 = vmul.f32 %v383_v49, %v366_v42 }
 0x674   :  { %388 = vrot.lane.b32.xlu0 %v385_v50, %s1481_s27 }
 0x6e6   :  { %v389_v51 = vpop.permute.xlu0 %388 }
 0x6e7   :  { %1291 = vmatmul.msk.f32.vlgmr.msra.gmra.mxu1 %vm192_vm2, %v389_v51 }
 0x6e8   :  { %788 = vmatpush.msra.mxu1 %v1537_v2 }
 0x6ea   :  { %789 = vmatpush.msra.mxu1 %v1543_v3 }
 0x6ec   :  { %790 = vmatpush.msra.mxu1 %v1554_v5 }
 0x6ee   :  { %791 = vmatpush.msra.mxu1 %v1562_v6 }
 0x764   :  { %v409_v54 = vpop.f32.mrf.mxu1 }
 0x765   :  { %v412_v55 = vadd.f32 %v409_v54, %v131_v53  ;;  %v35_v54 = vld [vmem:[%s1832_s0 + $0x28] sm:$0xff] }
 0x766   :  { %1274 = vmatmul.msk.f32.gmra.mxu0 %vm51_vm1, %v35_v54 }
 0x767   :  { %1349 = vtanh.f32 %v412_v55  ;;  %v1292_v57 = vmul.f32 -1.442695, %v412_v55 }
 0x769   :  { %1351 = vpow2.f32 %v1292_v57 }
 0x76d   :  { %v1350_v56 = vpop.eup %1349 }
 0x76e   :  { %435 = vrot.lane.b32.xlu1 %v1350_v56, %s1480_s24  ;;  %1275 = vmatmul.msk.f32.gmra.mxu0 %vm51_vm1, %v36_v28 }
 0x76f   :  { %v1352_v58 = vpop.eup %1351 }
 0x770   :  { %v416_v59 = vadd.f32 1.0, %v1352_v58 }
 0x772   :  { %1353 = vrcp.f32 %v416_v59  ;;  %v428_v1 = vand.u32 2147483648, %v416_v59  ;;  %vm422_vm0 = vweird.f32 %v416_v59  ;;  %v426_v4 = vand.u32 2147483647, %v416_v59 }
 0x774   :  { %v429_v8 = vor.u32 1.1754944e-38, %v428_v1  ;;  %vm427_vm4 = vcmp.eq.f32.partialorder %v426_v4, 8.507059e+37 }
 0x778   :  { %v1354_v60 = vpop.eup %1353 }
 0x779   :  { %v418_v61 = vmul.f32 %v1354_v60, %v416_v59  ;;  %vm423_vm15 = vweird.f32 %v1354_v60 }
 0x77a   :  { %vm424_vm3 = vmor %vm422_vm0, %vm423_vm15 }
 0x77b   :  { %v419_v62 = vsub.f32 1.0, %v418_v61 }
 0x77d   :  { %v420_v63 = vmul.f32 %v1354_v60, %v419_v62 }
 0x77f   :  { %v421_v0 = vadd.f32 %v1354_v60, %v420_v63 }
 0x781   :  { %v425_v7 = vsel %vm424_vm3, %v1354_v60, %v421_v0 }
 0x782   :  { %v430_v13 = vsel %vm427_vm4, %v429_v8, %v425_v7 }
 0x783   :  { %v433_v16 = vmul.f32 %v430_v13, %v379_v46 }
 0x7e0   :  { %v436_v9 = vpop.permute.xlu1 %435 }
 0x7e1   :  { %v438_v15 = vmul.f32 %v436_v9, %v430_v13 }
 0x7e3   :  { %440 = vrot.lane.b32.xlu2 %v438_v15, %s1481_s27  ;;  %v136_v56 = vpop.f32.mrf.mxu0 }
 0x7e4   :  { %v137_v57 = vadd.f32 %v1604_v14, %v136_v56 }
 0x83d   :  { %v441_v17 = vpop.permute.xlu2 %440 }
 0x83e   :  { %v443_v18 = vadd.f32 %v441_v17, %v433_v16 }
 0x840   :  { %1355 = vtanh.f32 %v443_v18 }
 0x846   :  { %v1356_v19 = vpop.eup %1355 }
 0x847   :  { %446 = vrot.lane.b32.xlu0 %v1356_v19, %s1480_s24 }
 0x8b9   :  { %v447_v24 = vpop.permute.xlu0 %446 }
 0x8ba   :  { %v449_v25 = vmul.f32 %v447_v24, %v430_v13 }
 0x8bc   :  { %452 = vrot.lane.b32.xlu1 %v449_v25, %s1481_s27 }
 0x92e   :  { %v453_v27 = vpop.permute.xlu1 %452 }
 0x92f   :  { %1293 = vmatmul.msk.f32.vlgmr.msrb.gmra.mxu2 %vm192_vm2, %v453_v27 }
 0x930   :  { %852 = vmatpush.msrb.mxu2 %v1537_v2 }
 0x932   :  { %853 = vmatpush.msrb.mxu2 %v1543_v3 }
 0x934   :  { %854 = vmatpush.msrb.mxu2 %v1554_v5 }
 0x936   :  { %855 = vmatpush.msrb.mxu2 %v1562_v6 }
 0x9b2   :  { %v473_v30 = vpop.f32.mrf.mxu2 }
 0x9b3   :  { %v476_v31 = vadd.f32 %v473_v30, %v134_v29 }
 0x9b5   :  { %1357 = vtanh.f32 %v476_v31  ;;  %v1294_v33 = vmul.f32 -1.442695, %v476_v31 }
 0x9b7   :  { %1359 = vpow2.f32 %v1294_v33 }
 0x9bb   :  { %v1358_v32 = vpop.eup %1357 }
 0x9bc   :  { %499 = vrot.lane.b32.xlu2 %v1358_v32, %s1480_s24  ;;  %v139_v32 = vpop.f32.mrf.mxu0 }
 0x9bd   :  { %v1360_v34 = vpop.eup %1359  ;;  %v140_v33 = vadd.f32 %v1604_v14, %v139_v32 }
 0x9be   :  { %v480_v35 = vadd.f32 1.0, %v1360_v34 }
 0x9c0   :  { %1361 = vrcp.f32 %v480_v35  ;;  %v492_v41 = vand.u32 2147483648, %v480_v35  ;;  %vm486_vm6 = vweird.f32 %v480_v35  ;;  %v490_v42 = vand.u32 2147483647, %v480_v35 }
 0x9c2   :  { %v493_v44 = vor.u32 1.1754944e-38, %v492_v41  ;;  %vm491_vm8 = vcmp.eq.f32.partialorder %v490_v42, 8.507059e+37 }
 0x9c6   :  { %v1362_v36 = vpop.eup %1361 }
 0x9c7   :  { %v482_v37 = vmul.f32 %v1362_v36, %v480_v35  ;;  %vm487_vm5 = vweird.f32 %v1362_v36 }
 0x9c8   :  { %vm488_vm7 = vmor %vm486_vm6, %vm487_vm5 }
 0x9c9   :  { %v483_v38 = vsub.f32 1.0, %v482_v37 }
 0x9cb   :  { %v484_v39 = vmul.f32 %v1362_v36, %v483_v38 }
 0x9cd   :  { %v485_v40 = vadd.f32 %v1362_v36, %v484_v39 }
 0x9cf   :  { %v489_v43 = vsel %vm488_vm7, %v1362_v36, %v485_v40 }
 0x9d0   :  { %v494_v46 = vsel %vm491_vm8, %v493_v44, %v489_v43 }
 0x9d1   :  { %v497_v48 = vmul.f32 %v494_v46, %v443_v18 }
 0xa16   :  { %v500_v45 = vpop.permute.xlu2 %499 }
 0xa17   :  { %v502_v47 = vmul.f32 %v500_v45, %v494_v46 }
 0xa19   :  { %504 = vrot.lane.b32.xlu0 %v502_v47, %s1481_s27 }
 0xa8b   :  { %v505_v49 = vpop.permute.xlu0 %504 }
 0xa8c   :  { %v507_v50 = vadd.f32 %v505_v49, %v497_v48 }
 0xa8e   :  { %1363 = vtanh.f32 %v507_v50 }
 0xa94   :  { %v1364_v51 = vpop.eup %1363 }
 0xa95   :  { %510 = vrot.lane.b32.xlu1 %v1364_v51, %s1480_s24 }
 0xb07   :  { %v511_v52 = vpop.permute.xlu1 %510 }
 0xb08   :  { %v513_v53 = vmul.f32 %v511_v52, %v494_v46 }
 0xb0a   :  { %516 = vrot.lane.b32.xlu2 %v513_v53, %s1481_s27 }
 0xb64   :  { %v517_v55 = vpop.permute.xlu2 %516 }
 0xb65   :  { %1295 = vmatmul.msk.f32.vlgmr.msra.gmra.mxu3 %vm192_vm2, %v517_v55 }
 0xb66   :  { %916 = vmatpush.msra.mxu3 %v1537_v2 }
 0xb68   :  { %917 = vmatpush.msra.mxu3 %v1543_v3 }
 0xb6a   :  { %918 = vmatpush.msra.mxu3 %v1554_v5 }
 0xb6c   :  { %919 = vmatpush.msra.mxu3 %v1562_v6 }
 0xbe8   :  { %v537_v58 = vpop.f32.mrf.mxu3 }
 0xbe9   :  { %v540_v59 = vadd.f32 %v537_v58, %v137_v57  ;;  %v37_v58 = vld [vmem:[%s1832_s0 + $0x38] sm:$0xff] }
 0xbea   :  { %1276 = vmatmul.msk.f32.gmra.mxu0 %vm51_vm1, %v37_v58 }
 0xbeb   :  { %1365 = vtanh.f32 %v540_v59  ;;  %v1296_v61 = vmul.f32 -1.442695, %v540_v59 }
 0xbed   :  { %1367 = vpow2.f32 %v1296_v61 }
 0xbf1   :  { %v1366_v60 = vpop.eup %1365 }
 0xbf2   :  { %563 = vrot.lane.b32.xlu0 %v1366_v60, %s1480_s24 }
 0xbf3   :  { %v1368_v62 = vpop.eup %1367 }
 0xbf4   :  { %v544_v63 = vadd.f32 1.0, %v1368_v62 }
 0xbf6   :  { %1369 = vrcp.f32 %v544_v63  ;;  %v556_v9 = vand.u32 2147483648, %v544_v63  ;;  %vm550_vm10 = vweird.f32 %v544_v63  ;;  %v554_v13 = vand.u32 2147483647, %v544_v63 }
 0xbf8   :  { %v557_v16 = vor.u32 1.1754944e-38, %v556_v9  ;;  %vm555_vm12 = vcmp.eq.f32.partialorder %v554_v13, 8.507059e+37 }
 0xbfc   :  { %v1370_v0 = vpop.eup %1369 }
 0xbfd   :  { %v546_v1 = vmul.f32 %v1370_v0, %v544_v63  ;;  %vm551_vm9 = vweird.f32 %v1370_v0 }
 0xbfe   :  { %vm552_vm11 = vmor %vm550_vm10, %vm551_vm9 }
 0xbff   :  { %v547_v4 = vsub.f32 1.0, %v546_v1 }
 0xc01   :  { %v548_v7 = vmul.f32 %v1370_v0, %v547_v4 }
 0xc03   :  { %v549_v8 = vadd.f32 %v1370_v0, %v548_v7 }
 0xc05   :  { %v553_v15 = vsel %vm552_vm11, %v1370_v0, %v549_v8 }
 0xc06   :  { %v558_v18 = vsel %vm555_vm12, %v557_v16, %v553_v15 }
 0xc07   :  { %v561_v24 = vmul.f32 %v558_v18, %v507_v50 }
 0xc64   :  { %v564_v17 = vpop.permute.xlu0 %563 }
 0xc65   :  { %v566_v19 = vmul.f32 %v564_v17, %v558_v18 }
 0xc67   :  { %568 = vrot.lane.b32.xlu1 %v566_v19, %s1481_s27  ;;  %v142_v60 = vpop.f32.mrf.mxu0 }
 0xc68   :  { %v143_v61 = vadd.f32 %v1604_v14, %v142_v60 }
 0xcd9   :  { %v569_v25 = vpop.permute.xlu1 %568 }
 0xcda   :  { %v571_v26 = vadd.f32 %v569_v25, %v561_v24 }
 0xcdc   :  { %1371 = vtanh.f32 %v571_v26 }
 0xce2   :  { %v1372_v27 = vpop.eup %1371 }
 0xce3   :  { %574 = vrot.lane.b32.xlu2 %v1372_v27, %s1480_s24 }
 0xd3d   :  { %v575_v29 = vpop.permute.xlu2 %574 }
 0xd3e   :  { %v577_v30 = vmul.f32 %v575_v29, %v558_v18 }
 0xd40   :  { %580 = vrot.lane.b32.xlu0 %v577_v30, %s1481_s27 }
 0xdb2   :  { %v581_v31 = vpop.permute.xlu0 %580 }
 0xdb3   :  { %1297 = vmatmul.msk.f32.vlgmr.msrb.gmra.mxu1 %vm192_vm2, %v581_v31 }
 0xdb4   :  { %980 = vmatpush.msrb.mxu1 %v1537_v2 }
 0xdb6   :  { %981 = vmatpush.msrb.mxu1 %v1543_v3 }
 0xdb8   :  { %982 = vmatpush.msrb.mxu1 %v1554_v5 }
 0xdba   :  { %983 = vmatpush.msrb.mxu1 %v1562_v6 }
 0xe30   :  { %v601_v34 = vpop.f32.mrf.mxu1 }
 0xe31   :  { %v604_v35 = vadd.f32 %v601_v34, %v140_v33  ;;  %v38_v34 = vld [vmem:[%s1832_s0 + $0x40] sm:$0xff] }
 0xe32   :  { %1277 = vmatmul.msk.f32.gmra.mxu0 %vm51_vm1, %v38_v34 }
 0xe33   :  { %1373 = vtanh.f32 %v604_v35  ;;  %v1298_v37 = vmul.f32 -1.442695, %v604_v35 }
 0xe35   :  { %1375 = vpow2.f32 %v1298_v37 }
 0xe39   :  { %v1374_v36 = vpop.eup %1373 }
 0xe3a   :  { %627 = vrot.lane.b32.xlu1 %v1374_v36, %s1480_s24 }
 0xe3b   :  { %v1376_v38 = vpop.eup %1375 }
 0xe3c   :  { %v608_v39 = vadd.f32 1.0, %v1376_v38 }
 0xe3e   :  { %1377 = vrcp.f32 %v608_v39  ;;  %v620_v45 = vand.u32 2147483648, %v608_v39  ;;  %vm614_vm14 = vweird.f32 %v608_v39  ;;  %v618_v46 = vand.u32 2147483647, %v608_v39 }
 0xe40   :  { %v621_v48 = vor.u32 1.1754944e-38, %v620_v45  ;;  %vm619_vm0 = vcmp.eq.f32.partialorder %v618_v46, 8.507059e+37 }
 0xe44   :  { %v1378_v40 = vpop.eup %1377 }
 0xe45   :  { %v610_v41 = vmul.f32 %v1378_v40, %v608_v39  ;;  %vm615_vm13 = vweird.f32 %v1378_v40 }
 0xe46   :  { %vm616_vm15 = vmor %vm614_vm14, %vm615_vm13 }
 0xe47   :  { %v611_v42 = vsub.f32 1.0, %v610_v41 }
 0xe49   :  { %v612_v43 = vmul.f32 %v1378_v40, %v611_v42 }
 0xe4b   :  { %v613_v44 = vadd.f32 %v1378_v40, %v612_v43 }
 0xe4d   :  { %v617_v47 = vsel %vm616_vm15, %v1378_v40, %v613_v44 }
 0xe4e   :  { %v622_v50 = vsel %vm619_vm0, %v621_v48, %v617_v47 }
 0xe4f   :  { %v625_v52 = vmul.f32 %v622_v50, %v571_v26 }
 0xeac   :  { %v628_v49 = vpop.permute.xlu1 %627 }
 0xead   :  { %v630_v51 = vmul.f32 %v628_v49, %v622_v50 }
 0xeaf   :  { %632 = vrot.lane.b32.xlu2 %v630_v51, %s1481_s27  ;;  %v145_v36 = vpop.f32.mrf.mxu0 }
 0xeb0   :  { %v146_v37 = vadd.f32 %v1604_v14, %v145_v36 }
 0xf09   :  { %v633_v53 = vpop.permute.xlu2 %632 }
 0xf0a   :  { %v635_v54 = vadd.f32 %v633_v53, %v625_v52 }
 0xf0c   :  { %1379 = vtanh.f32 %v635_v54 }
 0xf12   :  { %v1380_v55 = vpop.eup %1379 }
 0xf13   :  { %638 = vrot.lane.b32.xlu0 %v1380_v55, %s1480_s24 }
 0xf85   :  { %v639_v56 = vpop.permute.xlu0 %638 }
 0xf86   :  { %v641_v57 = vmul.f32 %v639_v56, %v622_v50 }
 0xf88   :  { %644 = vrot.lane.b32.xlu1 %v641_v57, %s1481_s27 }
 0xffa   :  { %v645_v59 = vpop.permute.xlu1 %644 }
 0xffb   :  { %1299 = vmatmul.msk.f32.vlgmr.msra.gmra.mxu2 %vm192_vm2, %v645_v59 }
 0xffc   :  { %1044 = vmatpush.msra.mxu2 %v1537_v2 }
 0xffe   :  { %1045 = vmatpush.msra.mxu2 %v1543_v3 }
0x1000   :  { %1046 = vmatpush.msra.mxu2 %v1554_v5 }
0x1002   :  { %1047 = vmatpush.msra.mxu2 %v1562_v6 }
0x107e   :  { %v665_v62 = vpop.f32.mrf.mxu2 }
0x107f   :  { %v668_v63 = vadd.f32 %v665_v62, %v143_v61 }
0x1081   :  { %1381 = vtanh.f32 %v668_v63  ;;  %v1300_v1 = vmul.f32 -1.442695, %v668_v63  ;;  %v149_v63 = vadd.f32 %v1604_v14, %v1595_v10 }
0x1083   :  { %1383 = vpow2.f32 %v1300_v1 }
0x1087   :  { %v1382_v0 = vpop.eup %1381 }
0x1088   :  { %691 = vrot.lane.b32.xlu2 %v1382_v0, %s1480_s24 }
0x1089   :  { %v1384_v4 = vpop.eup %1383 }
0x108a   :  { %v672_v7 = vadd.f32 1.0, %v1384_v4 }
0x108c   :  { %1385 = vrcp.f32 %v672_v7  ;;  %v684_v17 = vand.u32 2147483648, %v672_v7  ;;  %vm678_vm4 = vweird.f32 %v672_v7  ;;  %v682_v18 = vand.u32 2147483647, %v672_v7 }
0x108e   :  { %v685_v24 = vor.u32 1.1754944e-38, %v684_v17  ;;  %vm683_vm6 = vcmp.eq.f32.partialorder %v682_v18, 8.507059e+37 }
0x1092   :  { %v1386_v8 = vpop.eup %1385 }
0x1093   :  { %v674_v9 = vmul.f32 %v1386_v8, %v672_v7  ;;  %vm679_vm3 = vweird.f32 %v1386_v8 }
0x1094   :  { %vm680_vm5 = vmor %vm678_vm4, %vm679_vm3 }
0x1095   :  { %v675_v13 = vsub.f32 1.0, %v674_v9 }
0x1097   :  { %v676_v15 = vmul.f32 %v1386_v8, %v675_v13 }
0x1099   :  { %v677_v16 = vadd.f32 %v1386_v8, %v676_v15 }
0x109b   :  { %v681_v19 = vsel %vm680_vm5, %v1386_v8, %v677_v16 }
0x109c   :  { %v686_v26 = vsel %vm683_vm6, %v685_v24, %v681_v19 }
0x109d   :  { %v689_v28 = vmul.f32 %v686_v26, %v635_v54 }
0x10e2   :  { %v692_v25 = vpop.permute.xlu2 %691 }
0x10e3   :  { %v694_v27 = vmul.f32 %v692_v25, %v686_v26 }
0x10e5   :  { %696 = vrot.lane.b32.xlu0 %v694_v27, %s1481_s27 }
0x1157   :  { %v697_v29 = vpop.permute.xlu0 %696 }
0x1158   :  { %v699_v30 = vadd.f32 %v697_v29, %v689_v28 }
0x115a   :  { %1387 = vtanh.f32 %v699_v30 }
0x1160   :  { %v1388_v31 = vpop.eup %1387 }
0x1161   :  { %702 = vrot.lane.b32.xlu1 %v1388_v31, %s1480_s24 }
0x11d3   :  { %v703_v32 = vpop.permute.xlu1 %702 }
0x11d4   :  { %v705_v33 = vmul.f32 %v703_v32, %v686_v26  ;;  %v152_v32 = vadd.f32 %v1604_v14, %v1597_v11 }
0x11d6   :  { %708 = vrot.lane.b32.xlu2 %v705_v33, %s1481_s27 }
0x1230   :  { %v709_v35 = vpop.permute.xlu2 %708 }
0x1231   :  { %1301 = vmatmul.msk.f32.vlgmr.msrb.gmra.mxu3 %vm192_vm2, %v709_v35 }
0x1232   :  { %1108 = vmatpush.msrb.mxu3 %v1537_v2 }
0x1234   :  { %1109 = vmatpush.msrb.mxu3 %v1543_v3 }
0x1236   :  { %1110 = vmatpush.msrb.mxu3 %v1554_v5 }
0x1238   :  { %1111 = vmatpush.msrb.mxu3 %v1562_v6 }
0x12b4   :  { %v729_v38 = vpop.f32.mrf.mxu3 }
0x12b5   :  { %v732_v39 = vadd.f32 %v729_v38, %v146_v37 }
0x12b7   :  { %1389 = vtanh.f32 %v732_v39  ;;  %v1302_v41 = vmul.f32 -1.442695, %v732_v39 }
0x12b9   :  { %1391 = vpow2.f32 %v1302_v41 }
0x12bd   :  { %v1390_v40 = vpop.eup %1389 }
0x12be   :  { %755 = vrot.lane.b32.xlu0 %v1390_v40, %s1480_s24 }
0x12bf   :  { %v1392_v42 = vpop.eup %1391 }
0x12c0   :  { %v736_v43 = vadd.f32 1.0, %v1392_v42 }
0x12c2   :  { %1393 = vrcp.f32 %v736_v43  ;;  %v748_v49 = vand.u32 2147483648, %v736_v43  ;;  %vm742_vm7 = vweird.f32 %v736_v43  ;;  %v746_v50 = vand.u32 2147483647, %v736_v43 }
0x12c4   :  { %v749_v52 = vor.u32 1.1754944e-38, %v748_v49  ;;  %vm747_vm9 = vcmp.eq.f32.partialorder %v746_v50, 8.507059e+37 }
0x12c8   :  { %v1394_v44 = vpop.eup %1393 }
0x12c9   :  { %v738_v45 = vmul.f32 %v1394_v44, %v736_v43  ;;  %vm743_vm1 = vweird.f32 %v1394_v44 }
0x12ca   :  { %vm744_vm8 = vmor %vm742_vm7, %vm743_vm1 }
0x12cb   :  { %v739_v46 = vsub.f32 1.0, %v738_v45 }
0x12cd   :  { %v740_v47 = vmul.f32 %v1394_v44, %v739_v46 }
0x12cf   :  { %v741_v48 = vadd.f32 %v1394_v44, %v740_v47 }
0x12d1   :  { %v745_v51 = vsel %vm744_vm8, %v1394_v44, %v741_v48 }
0x12d2   :  { %v750_v54 = vsel %vm747_vm9, %v749_v52, %v745_v51 }
0x12d3   :  { %v753_v56 = vmul.f32 %v750_v54, %v699_v30 }
0x1330   :  { %v756_v53 = vpop.permute.xlu0 %755 }
0x1331   :  { %v758_v55 = vmul.f32 %v756_v53, %v750_v54 }
0x1333   :  { %760 = vrot.lane.b32.xlu1 %v758_v55, %s1481_s27 }
0x13a5   :  { %v761_v57 = vpop.permute.xlu1 %760 }
0x13a6   :  { %v763_v58 = vadd.f32 %v761_v57, %v753_v56  ;;  %v155_v57 = vadd.f32 %v1604_v14, %v1599_v12 }
0x13a8   :  { %1395 = vtanh.f32 %v763_v58 }
0x13ae   :  { %v1396_v59 = vpop.eup %1395 }
0x13af   :  { %766 = vrot.lane.b32.xlu2 %v1396_v59, %s1480_s24 }
0x1409   :  { %v767_v60 = vpop.permute.xlu2 %766 }
0x140a   :  { %v769_v61 = vmul.f32 %v767_v60, %v750_v54 }
0x140c   :  { %772 = vrot.lane.b32.xlu0 %v769_v61, %s1481_s27 }
0x147e   :  { %v773_v62 = vpop.permute.xlu0 %772 }
0x147f   :  { %1303 = vmatmul.msk.f32.vlgmr.msra.gmra.mxu1 %vm192_vm2, %v773_v62 }
0x1480   :  { %1172 = vmatpush.msra.mxu1 %v1537_v2 }
0x1482   :  { %1173 = vmatpush.msra.mxu1 %v1543_v3 }
0x1484   :  { %1174 = vmatpush.msra.mxu1 %v1554_v5 }
0x1486   :  { %1175 = vmatpush.msra.mxu1 %v1562_v6 }
0x14fc   :  { %v793_v0 = vpop.f32.mrf.mxu1 }
0x14fd   :  { %v796_v1 = vadd.f32 %v793_v0, %v149_v63 }
0x14ff   :  { %1397 = vtanh.f32 %v796_v1  ;;  %v1304_v7 = vmul.f32 -1.442695, %v796_v1 }
0x1501   :  { %1399 = vpow2.f32 %v1304_v7 }
0x1505   :  { %v1398_v4 = vpop.eup %1397 }
0x1506   :  { %819 = vrot.lane.b32.xlu1 %v1398_v4, %s1480_s24 }
0x1507   :  { %v1400_v8 = vpop.eup %1399 }
0x1508   :  { %v800_v9 = vadd.f32 1.0, %v1400_v8 }
0x150a   :  { %1401 = vrcp.f32 %v800_v9  ;;  %v812_v6 = vand.u32 2147483648, %v800_v9  ;;  %vm806_vm11 = vweird.f32 %v800_v9  ;;  %v810_v10 = vand.u32 2147483647, %v800_v9 }
0x150c   :  { %v813_v17 = vor.u32 1.1754944e-38, %v812_v6  ;;  %vm811_vm13 = vcmp.eq.f32.partialorder %v810_v10, 8.507059e+37 }
0x1510   :  { %v1402_v2 = vpop.eup %1401 }
0x1511   :  { %v802_v3 = vmul.f32 %v1402_v2, %v800_v9  ;;  %vm807_vm10 = vweird.f32 %v1402_v2 }
0x1512   :  { %vm808_vm12 = vmor %vm806_vm11, %vm807_vm10 }
0x1513   :  { %v803_v13 = vsub.f32 1.0, %v802_v3 }
0x1515   :  { %v804_v5 = vmul.f32 %v1402_v2, %v803_v13 }
0x1517   :  { %v805_v15 = vadd.f32 %v1402_v2, %v804_v5 }
0x1519   :  { %v809_v16 = vsel %vm808_vm12, %v1402_v2, %v805_v15 }
0x151a   :  { %v814_v19 = vsel %vm811_vm13, %v813_v17, %v809_v16 }
0x151b   :  { %v817_v25 = vmul.f32 %v814_v19, %v763_v58 }
0x1578   :  { %v820_v18 = vpop.permute.xlu1 %819 }
0x1579   :  { %v822_v24 = vmul.f32 %v820_v18, %v814_v19 }
0x157b   :  { %824 = vrot.lane.b32.xlu2 %v822_v24, %s1481_s27  ;;  %v1784_v24 = vld [vmem:[%s1836_s4] ss:$0 sm:$0xff] }
0x15d5   :  { %v825_v26 = vpop.permute.xlu2 %824 }
0x15d6   :  { %v827_v27 = vadd.f32 %v825_v26, %v817_v25  ;;  %v158_v25 = vadd.f32 %v1784_v24, %v1658_v20 }
0x15d8   :  { %1403 = vtanh.f32 %v827_v27 }
0x15de   :  { %v1404_v28 = vpop.eup %1403 }
0x15df   :  { %830 = vrot.lane.b32.xlu0 %v1404_v28, %s1480_s24 }
0x1651   :  { %v831_v29 = vpop.permute.xlu0 %830 }
0x1652   :  { %v833_v30 = vmul.f32 %v831_v29, %v814_v19 }
0x1654   :  { %836 = vrot.lane.b32.xlu1 %v833_v30, %s1481_s27 }
0x16c6   :  { %v837_v31 = vpop.permute.xlu1 %836 }
0x16c7   :  { %1305 = vmatmul.msk.f32.vlgmr.msrb.gmra.mxu2 %vm192_vm2, %v837_v31 }
0x174a   :  { %v857_v33 = vpop.f32.mrf.mxu2 }
0x174b   :  { %v860_v34 = vadd.f32 %v857_v33, %v152_v32 }
0x174d   :  { %1405 = vtanh.f32 %v860_v34  ;;  %v1306_v36 = vmul.f32 -1.442695, %v860_v34 }
0x174f   :  { %1407 = vpow2.f32 %v1306_v36 }
0x1753   :  { %v1406_v35 = vpop.eup %1405 }
0x1754   :  { %883 = vrot.lane.b32.xlu2 %v1406_v35, %s1480_s24 }
0x1755   :  { %v1408_v37 = vpop.eup %1407 }
0x1756   :  { %v864_v38 = vadd.f32 1.0, %v1408_v37 }
0x1758   :  { %1409 = vrcp.f32 %v864_v38  ;;  %v876_v44 = vand.u32 2147483648, %v864_v38  ;;  %vm870_vm15 = vweird.f32 %v864_v38  ;;  %v874_v11 = vand.u32 2147483647, %v864_v38 }
0x175a   :  { %v877_v46 = vor.u32 1.1754944e-38, %v876_v44  ;;  %vm875_vm3 = vcmp.eq.f32.partialorder %v874_v11, 8.507059e+37 }
0x175e   :  { %v1410_v39 = vpop.eup %1409 }
0x175f   :  { %v866_v40 = vmul.f32 %v1410_v39, %v864_v38  ;;  %vm871_vm14 = vweird.f32 %v1410_v39 }
0x1760   :  { %vm872_vm0 = vmor %vm870_vm15, %vm871_vm14 }
0x1761   :  { %v867_v41 = vsub.f32 1.0, %v866_v40 }
0x1763   :  { %v868_v42 = vmul.f32 %v1410_v39, %v867_v41 }
0x1765   :  { %v869_v43 = vadd.f32 %v1410_v39, %v868_v42 }
0x1767   :  { %v873_v45 = vsel %vm872_vm0, %v1410_v39, %v869_v43 }
0x1768   :  { %v878_v48 = vsel %vm875_vm3, %v877_v46, %v873_v45 }
0x1769   :  { %v881_v50 = vmul.f32 %v878_v48, %v827_v27 }
0x17ae   :  { %v884_v47 = vpop.permute.xlu2 %883 }
0x17af   :  { %v886_v49 = vmul.f32 %v884_v47, %v878_v48 }
0x17b1   :  { %888 = vrot.lane.b32.xlu0 %v886_v49, %s1481_s27  ;;  %v161_v49 = vadd.f32 %v1784_v24, %v1660_v21 }
0x1823   :  { %v889_v51 = vpop.permute.xlu0 %888 }
0x1824   :  { %v891_v52 = vadd.f32 %v889_v51, %v881_v50 }
0x1826   :  { %1411 = vtanh.f32 %v891_v52 }
0x182c   :  { %v1412_v53 = vpop.eup %1411 }
0x182d   :  { %894 = vrot.lane.b32.xlu1 %v1412_v53, %s1480_s24 }
0x189f   :  { %v895_v54 = vpop.permute.xlu1 %894 }
0x18a0   :  { %v897_v55 = vmul.f32 %v895_v54, %v878_v48 }
0x18a2   :  { %900 = vrot.lane.b32.xlu2 %v897_v55, %s1481_s27 }
0x18fc   :  { %v901_v56 = vpop.permute.xlu2 %900 }
0x18fd   :  { %1307 = vmatmul.msk.f32.vlgmr.msra.gmra.mxu3 %vm192_vm2, %v901_v56 }
0x1980   :  { %v921_v58 = vpop.f32.mrf.mxu3 }
0x1981   :  { %v924_v59 = vadd.f32 %v921_v58, %v155_v57 }
0x1983   :  { %1413 = vtanh.f32 %v924_v59  ;;  %v1308_v61 = vmul.f32 -1.442695, %v924_v59 }
0x1985   :  { %1415 = vpow2.f32 %v1308_v61 }
0x1989   :  { %v1414_v60 = vpop.eup %1413 }
0x198a   :  { %947 = vrot.lane.b32.xlu0 %v1414_v60, %s1480_s24 }
0x198b   :  { %v1416_v62 = vpop.eup %1415 }
0x198c   :  { %v928_v63 = vadd.f32 1.0, %v1416_v62 }
0x198e   :  { %1417 = vrcp.f32 %v928_v63  ;;  %v940_v9 = vand.u32 2147483648, %v928_v63  ;;  %vm934_vm5 = vweird.f32 %v928_v63  ;;  %v938_v12 = vand.u32 2147483647, %v928_v63 }
0x1990   :  { %v941_v2 = vor.u32 1.1754944e-38, %v940_v9  ;;  %vm939_vm1 = vcmp.eq.f32.partialorder %v938_v12, 8.507059e+37 }
0x1994   :  { %v1418_v0 = vpop.eup %1417 }
0x1995   :  { %v930_v1 = vmul.f32 %v1418_v0, %v928_v63  ;;  %vm935_vm4 = vweird.f32 %v1418_v0 }
0x1996   :  { %vm936_vm6 = vmor %vm934_vm5, %vm935_vm4 }
0x1997   :  { %v931_v4 = vsub.f32 1.0, %v930_v1 }
0x1999   :  { %v932_v7 = vmul.f32 %v1418_v0, %v931_v4 }
0x199b   :  { %v933_v8 = vadd.f32 %v1418_v0, %v932_v7 }
0x199d   :  { %v937_v14 = vsel %vm936_vm6, %v1418_v0, %v933_v8 }
0x199e   :  { %v942_v13 = vsel %vm939_vm1, %v941_v2, %v937_v14 }
0x199f   :  { %v945_v15 = vmul.f32 %v942_v13, %v891_v52 }
0x19fc   :  { %v948_v3 = vpop.permute.xlu0 %947 }
0x19fd   :  { %v950_v5 = vmul.f32 %v948_v3, %v942_v13 }
0x19ff   :  { %952 = vrot.lane.b32.xlu1 %v950_v5, %s1481_s27 }
0x1a71   :  { %v953_v6 = vpop.permute.xlu1 %952 }
0x1a72   :  { %v955_v10 = vadd.f32 %v953_v6, %v945_v15 }
0x1a74   :  { %1419 = vtanh.f32 %v955_v10 }
0x1a7a   :  { %v1420_v16 = vpop.eup %1419 }
0x1a7b   :  { %958 = vrot.lane.b32.xlu2 %v1420_v16, %s1480_s24 }
0x1ad5   :  { %v959_v17 = vpop.permute.xlu2 %958 }
0x1ad6   :  { %v961_v18 = vmul.f32 %v959_v17, %v942_v13  ;;  %v164_v13 = vadd.f32 %v1784_v24, %v1662_v22 }
0x1ad8   :  { %964 = vrot.lane.b32.xlu0 %v961_v18, %s1481_s27 }
0x1b4a   :  { %v965_v19 = vpop.permute.xlu0 %964 }
0x1b4b   :  { %1309 = vmatmul.msk.f32.vlgmr.msrb.gmra.mxu1 %vm192_vm2, %v965_v19 }
0x1bc8   :  { %v985_v26 = vpop.f32.mrf.mxu1 }
0x1bc9   :  { %v988_v27 = vadd.f32 %v985_v26, %v158_v25 }
0x1bcb   :  { %1421 = vtanh.f32 %v988_v27  ;;  %v1310_v29 = vmul.f32 -1.442695, %v988_v27 }
0x1bcd   :  { %1423 = vpow2.f32 %v1310_v29 }
0x1bd1   :  { %v1422_v28 = vpop.eup %1421 }
0x1bd2   :  { %1011 = vrot.lane.b32.xlu1 %v1422_v28, %s1480_s24 }
0x1bd3   :  { %v1424_v30 = vpop.eup %1423 }
0x1bd4   :  { %v992_v31 = vadd.f32 1.0, %v1424_v30 }
0x1bd6   :  { %1425 = vrcp.f32 %v992_v31  ;;  %v1004_v37 = vand.u32 2147483648, %v992_v31  ;;  %vm998_vm8 = vweird.f32 %v992_v31  ;;  %v1002_v20 = vand.u32 2147483647, %v992_v31 }
0x1bd8   :  { %v1005_v39 = vor.u32 1.1754944e-38, %v1004_v37  ;;  %vm1003_vm10 = vcmp.eq.f32.partialorder %v1002_v20, 8.507059e+37 }
0x1bdc   :  { %v1426_v32 = vpop.eup %1425 }
0x1bdd   :  { %v994_v33 = vmul.f32 %v1426_v32, %v992_v31  ;;  %vm999_vm7 = vweird.f32 %v1426_v32 }
0x1bde   :  { %vm1000_vm9 = vmor %vm998_vm8, %vm999_vm7 }
0x1bdf   :  { %v995_v34 = vsub.f32 1.0, %v994_v33 }
0x1be1   :  { %v996_v35 = vmul.f32 %v1426_v32, %v995_v34 }
0x1be3   :  { %v997_v36 = vadd.f32 %v1426_v32, %v996_v35 }
0x1be5   :  { %v1001_v38 = vsel %vm1000_vm9, %v1426_v32, %v997_v36 }
0x1be6   :  { %v1006_v41 = vsel %vm1003_vm10, %v1005_v39, %v1001_v38 }
0x1be7   :  { %v1009_v43 = vmul.f32 %v1006_v41, %v955_v10 }
0x1c44   :  { %v1012_v40 = vpop.permute.xlu1 %1011 }
0x1c45   :  { %v1014_v42 = vmul.f32 %v1012_v40, %v1006_v41  ;;  %v167_v40 = vadd.f32 %v1784_v24, %v1664_v23 }
0x1c47   :  { %1016 = vrot.lane.b32.xlu2 %v1014_v42, %s1481_s27 }
0x1ca1   :  { %v1017_v44 = vpop.permute.xlu2 %1016 }
0x1ca2   :  { %v1019_v11 = vadd.f32 %v1017_v44, %v1009_v43 }
0x1ca4   :  { %1427 = vtanh.f32 %v1019_v11 }
0x1caa   :  { %v1428_v45 = vpop.eup %1427 }
0x1cab   :  { %1022 = vrot.lane.b32.xlu0 %v1428_v45, %s1480_s24 }
0x1d1d   :  { %v1023_v46 = vpop.permute.xlu0 %1022 }
0x1d1e   :  { %v1025_v47 = vmul.f32 %v1023_v46, %v1006_v41 }
0x1d20   :  { %1028 = vrot.lane.b32.xlu1 %v1025_v47, %s1481_s27 }
0x1d92   :  { %v1029_v48 = vpop.permute.xlu1 %1028 }
0x1d93   :  { %1311 = vmatmul.msk.f32.vlgmr.msra.gmra.mxu2 %vm192_vm2, %v1029_v48 }
0x1e16   :  { %v1049_v50 = vpop.f32.mrf.mxu2 }
0x1e17   :  { %v1052_v51 = vadd.f32 %v1049_v50, %v161_v49 }
0x1e19   :  { %1429 = vtanh.f32 %v1052_v51  ;;  %v1312_v53 = vmul.f32 -1.442695, %v1052_v51 }
0x1e1b   :  { %1431 = vpow2.f32 %v1312_v53 }
0x1e1f   :  { %v1430_v52 = vpop.eup %1429 }
0x1e20   :  { %1075 = vrot.lane.b32.xlu2 %v1430_v52, %s1480_s24 }
0x1e21   :  { %v1432_v54 = vpop.eup %1431 }
0x1e22   :  { %v1056_v55 = vadd.f32 1.0, %v1432_v54 }
0x1e24   :  { %1433 = vrcp.f32 %v1056_v55  ;;  %v1068_v61 = vand.u32 2147483648, %v1056_v55  ;;  %vm1062_vm12 = vweird.f32 %v1056_v55  ;;  %v1066_v21 = vand.u32 2147483647, %v1056_v55 }
0x1e26   :  { %v1069_v63 = vor.u32 1.1754944e-38, %v1068_v61  ;;  %vm1067_vm14 = vcmp.eq.f32.partialorder %v1066_v21, 8.507059e+37  ;;  %v1220_v61 = vld [vmem:[%s1838_s6 + $0x10] sm:$0xff]  ;;  %v1219_v21 = vld [vmem:[%s1838_s6 + $0x8] sm:$0xff] }
0x1e2a   :  { %v1434_v56 = vpop.eup %1433 }
0x1e2b   :  { %v1058_v57 = vmul.f32 %v1434_v56, %v1056_v55  ;;  %vm1063_vm11 = vweird.f32 %v1434_v56 }
0x1e2c   :  { %vm1064_vm13 = vmor %vm1062_vm12, %vm1063_vm11 }
0x1e2d   :  { %v1059_v58 = vsub.f32 1.0, %v1058_v57 }
0x1e2f   :  { %v1060_v59 = vmul.f32 %v1434_v56, %v1059_v58 }
0x1e31   :  { %v1061_v60 = vadd.f32 %v1434_v56, %v1060_v59 }
0x1e33   :  { %v1065_v62 = vsel %vm1064_vm13, %v1434_v56, %v1061_v60  ;;  %v1221_v60 = vld [vmem:[%s1838_s6 + $0x18] sm:$0xff] }
0x1e34   :  { %v1070_v1 = vsel %vm1067_vm14, %v1069_v63, %v1065_v62  ;;  %1243 = vmatpush.msrb.mxu2 %v1221_v60  ;;  %v1218_v62 = vld [vmem:[%s1838_s6] sm:$0xff] }
0x1e35   :  { %v1073_v7 = vmul.f32 %v1070_v1, %v1019_v11 }
0x1e36   :  { %1244 = vmatpush.msrb.mxu2 %v1220_v61 }
0x1e38   :  { %1245 = vmatpush.msrb.mxu2 %v1219_v21 }
0x1e3a   :  { %1246 = vmatpush.msrb.mxu2 %v1218_v62 }
0x1e7a   :  { %v1076_v0 = vpop.permute.xlu2 %1075 }
0x1e7b   :  { %v1078_v4 = vmul.f32 %v1076_v0, %v1070_v1 }
0x1e7d   :  { %1080 = vrot.lane.b32.xlu0 %v1078_v4, %s1481_s27  ;;  %v1324_v4 = vld [vmem:[%s1839_s7] ss:$0 sm:$0xff] }
0x1eef   :  { %v1081_v8 = vpop.permute.xlu0 %1080 }
0x1ef0   :  { %v1083_v9 = vadd.f32 %v1081_v8, %v1073_v7 }
0x1ef2   :  { %1435 = vtanh.f32 %v1083_v9 }
0x1ef8   :  { %v1436_v12 = vpop.eup %1435 }
0x1ef9   :  { %1086 = vrot.lane.b32.xlu1 %v1436_v12, %s1480_s24 }
0x1f6b   :  { %v1087_v14 = vpop.permute.xlu1 %1086 }
0x1f6c   :  { %v1089_v2 = vmul.f32 %v1087_v14, %v1070_v1 }
0x1f6e   :  { %1092 = vrot.lane.b32.xlu2 %v1089_v2, %s1481_s27 }
0x1fc8   :  { %v1093_v3 = vpop.permute.xlu2 %1092 }
0x1fc9   :  { %1313 = vmatmul.msk.f32.vlgmr.msrb.gmra.mxu3 %vm192_vm2, %v1093_v3 }
0x204c   :  { %v1113_v5 = vpop.f32.mrf.mxu3 }
0x204d   :  { %v1116_v15 = vadd.f32 %v1113_v5, %v164_v13 }
0x204f   :  { %1437 = vtanh.f32 %v1116_v15  ;;  %v1314_v10 = vmul.f32 -1.442695, %v1116_v15 }
0x2051   :  { %1439 = vpow2.f32 %v1314_v10 }
0x2055   :  { %v1438_v6 = vpop.eup %1437 }
0x2056   :  { %1139 = vrot.lane.b32.xlu0 %v1438_v6, %s1480_s24 }
0x2057   :  { %v1440_v16 = vpop.eup %1439 }
0x2058   :  { %v1120_v17 = vadd.f32 1.0, %v1440_v16 }
0x205a   :  { %1441 = vrcp.f32 %v1120_v17  ;;  %v1132_v28 = vand.u32 2147483648, %v1120_v17  ;;  %vm1126_vm0 = vweird.f32 %v1120_v17  ;;  %v1130_v22 = vand.u32 2147483647, %v1120_v17 }
0x205c   :  { %v1133_v30 = vor.u32 1.1754944e-38, %v1132_v28  ;;  %vm1131_vm4 = vcmp.eq.f32.partialorder %v1130_v22, 8.507059e+37 }
0x2060   :  { %v1442_v18 = vpop.eup %1441 }
0x2061   :  { %v1122_v19 = vmul.f32 %v1442_v18, %v1120_v17  ;;  %vm1127_vm15 = vweird.f32 %v1442_v18 }
0x2062   :  { %vm1128_vm3 = vmor %vm1126_vm0, %vm1127_vm15 }
0x2063   :  { %v1123_v25 = vsub.f32 1.0, %v1122_v19 }
0x2065   :  { %v1124_v26 = vmul.f32 %v1442_v18, %v1123_v25 }
0x2067   :  { %v1125_v27 = vadd.f32 %v1442_v18, %v1124_v26 }
0x2069   :  { %v1129_v29 = vsel %vm1128_vm3, %v1442_v18, %v1125_v27 }
0x206a   :  { %v1134_v32 = vsel %vm1131_vm4, %v1133_v30, %v1129_v29 }
0x206b   :  { %v1137_v34 = vmul.f32 %v1134_v32, %v1083_v9 }
0x20c8   :  { %v1140_v31 = vpop.permute.xlu0 %1139 }
0x20c9   :  { %v1142_v33 = vmul.f32 %v1140_v31, %v1134_v32 }
0x20cb   :  { %1144 = vrot.lane.b32.xlu1 %v1142_v33, %s1481_s27 }
0x213d   :  { %v1145_v35 = vpop.permute.xlu1 %1144 }
0x213e   :  { %v1147_v36 = vadd.f32 %v1145_v35, %v1137_v34 }
0x2140   :  { %1443 = vtanh.f32 %v1147_v36 }
0x2146   :  { %v1444_v37 = vpop.eup %1443 }
0x2147   :  { %1150 = vrot.lane.b32.xlu2 %v1444_v37, %s1480_s24 }
0x21a1   :  { %v1151_v20 = vpop.permute.xlu2 %1150 }
0x21a2   :  { %v1153_v38 = vmul.f32 %v1151_v20, %v1134_v32 }
0x21a4   :  { %1156 = vrot.lane.b32.xlu0 %v1153_v38, %s1481_s27 }
0x2216   :  { %v1157_v39 = vpop.permute.xlu0 %1156 }
0x2217   :  { %1315 = vmatmul.msk.f32.vlgmr.msra.gmra.mxu1 %vm192_vm2, %v1157_v39 }
0x2294   :  { %v1177_v41 = vpop.f32.mrf.mxu1 }
0x2295   :  { %v1180_v42 = vadd.f32 %v1177_v41, %v167_v40 }
0x2297   :  { %1445 = vtanh.f32 %v1180_v42  ;;  %v1316_v44 = vmul.f32 -1.442695, %v1180_v42 }
0x2299   :  { %1447 = vpow2.f32 %v1316_v44 }
0x229d   :  { %v1446_v43 = vpop.eup %1445 }
0x229e   :  { %1203 = vrot.lane.b32.xlu1 %v1446_v43, %s1480_s24 }
0x229f   :  { %v1448_v11 = vpop.eup %1447 }
0x22a0   :  { %v1184_v45 = vadd.f32 1.0, %v1448_v11 }
0x22a2   :  { %1449 = vrcp.f32 %v1184_v45  ;;  %v1196_v51 = vand.u32 2147483648, %v1184_v45  ;;  %vm1190_vm6 = vweird.f32 %v1184_v45  ;;  %v1194_v23 = vand.u32 2147483647, %v1184_v45 }
0x22a4   :  { %v1197_v52 = vor.u32 1.1754944e-38, %v1196_v51  ;;  %vm1195_vm7 = vcmp.eq.f32.partialorder %v1194_v23, 8.507059e+37 }
0x22a8   :  { %v1450_v46 = vpop.eup %1449 }
0x22a9   :  { %v1186_v47 = vmul.f32 %v1450_v46, %v1184_v45  ;;  %vm1191_vm5 = vweird.f32 %v1450_v46 }
0x22aa   :  { %vm1192_vm1 = vmor %vm1190_vm6, %vm1191_vm5 }
0x22ab   :  { %v1187_v48 = vsub.f32 1.0, %v1186_v47 }
0x22ad   :  { %v1188_v49 = vmul.f32 %v1450_v46, %v1187_v48 }
0x22af   :  { %v1189_v50 = vadd.f32 %v1450_v46, %v1188_v49 }
0x22b1   :  { %v1193_v24 = vsel %vm1192_vm1, %v1450_v46, %v1189_v50 }
0x22b2   :  { %v1198_v54 = vsel %vm1195_vm7, %v1197_v52, %v1193_v24 }
0x22b3   :  { %v1201_v56 = vmul.f32 %v1198_v54, %v1147_v36 }
0x2310   :  { %v1204_v53 = vpop.permute.xlu1 %1203 }
0x2311   :  { %v1206_v55 = vmul.f32 %v1204_v53, %v1198_v54 }
0x2313   :  { %1208 = vrot.lane.b32.xlu2 %v1206_v55, %s1481_s27 }
0x236d   :  { %v1209_v57 = vpop.permute.xlu2 %1208 }
0x236e   :  { %v1211_v58 = vadd.f32 %v1209_v57, %v1201_v56 }
0x2370   :  { %1451 = vtanh.f32 %v1211_v58 }
0x2376   :  { %v1452_v59 = vpop.eup %1451 }
0x2377   :  { %1214 = vrot.lane.b32.xlu0 %v1452_v59, %s1480_s24 }
0x23e9   :  { %v1215_v63 = vpop.permute.xlu0 %1214 }
0x23ea   :  { %v1217_v0 = vmul.f32 %v1215_v63, %v1198_v54 }
0x23ec   :  { %1227 = vrot.lane.b32.xlu1 %v1217_v0, %s1481_s27 }
0x245e   :  { %v1228_v1 = vpop.permute.xlu1 %1227 }
0x245f   :  { %1317 = vmatmul.msk.f32.vlgmr.msrb.gmra.mxu2 %vm192_vm2, %v1228_v1 }
0x24e2   :  { %v1248_v7 = vpop.f32.mrf.mxu2 }
0x24e3   :  { %v1249_v8 = vadd.f32 %v1324_v4, %v1248_v7 }
0x24e5   :  { %1251 = vst [vmem:[#allocation3] sm:$0xff] %v1249_v8 }
0x24e6   :  { %1262 = dma.vmem_to_hbm [thread:$0]  %s1258_s14, 128, %s1260_s17, [#allocation4]  }
0x24e7   :  { %1478 = dma.done.wait [#allocation4], 128  }
0x24e8   :  { %1479 = vsyncadd [#allocation4], 4294967168 }
0x24e9   :  { %1267 = vsyncpa [#allocation4], 1 }

</bundles_post_ra>
